<compile_context>
chip_gen: v6e
topology: v6e:2x2x1
jax: 0.10.0
libtpu: 0.0.40
codegen_flags: <defaults>
</compile_context>

<pallas_src>
import jax
import jax.numpy as jnp
from jax.experimental import pallas as pl
from jax.experimental.pallas import tpu as pltpu

LANE = 128
MXU_DTYPE = jnp.bfloat16      # MXU operand dtype; accumulation is always f32
CONV2_CIN_PAD = 8             # conv1->conv2 channel pad (6 real + 2 zero)
CONV_M_TILE_CAP = 1024        # pooled-output rows per conv grid step
FC_M_TILE_CAP = 512           # rows per fc grid step


def _round_up(x, m):
    return (x + m - 1) // m * m


def _m_tiling(m, cap):
    """Pick an 8-aligned M tile and a padded M that is a multiple of it."""
    if m > cap:
        return cap, _round_up(m, cap)
    if m >= 256:                      # >=2 grid steps so v7x uses both TCs
        m_pad = _round_up(m, 16)
        return m_pad // 2, m_pad
    m_pad = _round_up(m, 8)
    return m_pad, m_pad


# ----------------------------------------------------------------------------
# Kernel 1: fused conv(as matmul) + bias + ReLU + 2x2 max-pool.
# cols block = (4*TM, Kp): the im2col rows of this M tile, grouped as four
# pool-phase slabs of TM rows.  One matmul, max over the four slabs, one
# bias+ReLU, bf16 writeback of the already-pooled activation.
# ----------------------------------------------------------------------------
def _conv_relu_pool_kernel(cols_ref, w_ref, b_ref, o_ref):
    tm = o_ref.shape[0]
    acc = jnp.dot(cols_ref[...], w_ref[...],
                  preferred_element_type=jnp.float32)          # (4*TM, N) f32
    pooled = jnp.maximum(jnp.maximum(acc[:tm], acc[tm:2 * tm]),
                         jnp.maximum(acc[2 * tm:3 * tm], acc[3 * tm:]))
    o_ref[...] = jnp.maximum(pooled + b_ref[...], 0.0).astype(o_ref.dtype)


def conv_relu_pool(phases, w_pad, b_pad, *, cap=CONV_M_TILE_CAP):
    """phases: (4, M, Kp) bf16 pool-phase im2col rows (M = B*PH*PW),
    w_pad: (Kp, 128) bf16, b_pad: (1, 128) f32.  Returns (M, 128) bf16."""
    _, m, kp = phases.shape
    n = w_pad.shape[1]
    tm, m_pad = _m_tiling(m, cap)
    steps = m_pad // tm
    if m_pad > m:
        phases = jnp.pad(phases, ((0, 0), (0, m_pad - m), (0, 0)))
    # Group rows per M tile so each grid step reads ONE contiguous 2-D block
    # of shape (4*tm, Kp) -- no in-kernel reshape, single DMA, single matmul.
    cols = phases.reshape(4, steps, tm, kp).transpose(1, 0, 2, 3)
    cols = cols.reshape(steps * 4 * tm, kp)

    flops = int(2 * 4 * m_pad * kp * n)
    bytes_acc = int(4 * m_pad * kp * cols.dtype.itemsize
                    + w_pad.size * w_pad.dtype.itemsize
                    + m_pad * n * 2)
    out = pl.pallas_call(
        _conv_relu_pool_kernel,
        out_shape=jax.ShapeDtypeStruct((m_pad, n), MXU_DTYPE),
        grid=(steps,),
        in_specs=[pl.BlockSpec((4 * tm, kp), lambda i: (i, 0)),
                  pl.BlockSpec((kp, n), lambda i: (0, 0)),
                  pl.BlockSpec((1, n), lambda i: (0, 0))],
        out_specs=pl.BlockSpec((tm, n), lambda i: (i, 0)),
        compiler_params=pltpu.CompilerParams(
            dimension_semantics=("parallel",)),
        cost_estimate=pl.CostEstimate(flops=flops, transcendentals=0,
                                      bytes_accessed=bytes_acc),
    )(cols, w_pad, b_pad)
    return out[:m]


# ----------------------------------------------------------------------------
# Kernel 2: fused fc1 + ReLU + fc2 + ReLU + fc3 (all weights VMEM-resident).
# ----------------------------------------------------------------------------
def _fc_stack_kernel(x_ref, w1_ref, b1_ref, w2_ref, b2_ref, w3_ref, b3_ref,
                     o_ref):
    h = jnp.dot(x_ref[...], w1_ref[...], preferred_element_type=jnp.float32)
    h = jnp.maximum(h + b1_ref[...], 0.0)
    h = jnp.dot(h.astype(w2_ref.dtype), w2_ref[...],
                preferred_element_type=jnp.float32)
    h = jnp.maximum(h + b2_ref[...], 0.0)
    h = jnp.dot(h.astype(w3_ref.dtype), w3_ref[...],
                preferred_element_type=jnp.float32)
    o_ref[...] = (h + b3_ref[...]).astype(o_ref.dtype)


def fc_stack(x, w1, b1, w2, b2, w3, b3, *, cap=FC_M_TILE_CAP):
    """x: (M, K) bf16 (K = 25*128 channel-padded conv2 output). -> (M,128) f32."""
    m, k = x.shape
    n1, n2, n3 = w1.shape[1], w2.shape[1], w3.shape[1]
    tm, m_pad = _m_tiling(m, cap)
    if m_pad > m:
        x = jnp.pad(x, ((0, m_pad - m), (0, 0)))
    steps = m_pad // tm

    flops = int(2 * m_pad * (k * n1 + n1 * n2 + n2 * n3))
    bytes_acc = int(m_pad * k * x.dtype.itemsize
                    + (w1.size + w2.size + w3.size) * w1.dtype.itemsize
                    + m_pad * n3 * 4)
    out = pl.pallas_call(
        _fc_stack_kernel,
        out_shape=jax.ShapeDtypeStruct((m_pad, n3), jnp.float32),
        grid=(steps,),
        in_specs=[pl.BlockSpec((tm, k), lambda i: (i, 0)),
                  pl.BlockSpec((k, n1), lambda i: (0, 0)),
                  pl.BlockSpec((1, n1), lambda i: (0, 0)),
                  pl.BlockSpec((n1, n2), lambda i: (0, 0)),
                  pl.BlockSpec((1, n2), lambda i: (0, 0)),
                  pl.BlockSpec((n2, n3), lambda i: (0, 0)),
                  pl.BlockSpec((1, n3), lambda i: (0, 0))],
        out_specs=pl.BlockSpec((tm, n3), lambda i: (i, 0)),
        compiler_params=pltpu.CompilerParams(
            dimension_semantics=("parallel",)),
        cost_estimate=pl.CostEstimate(flops=flops, transcendentals=0,
                                      bytes_accessed=bytes_acc),
    )(x, w1, b1, w2, b2, w3, b3)
    return out[:m]


# ----------------------------------------------------------------------------
# Glue: im2col (NHWC, columns ordered (kh, kw, Cin)), materialized ONCE as a
# single stacked-phase bf16 array (4, B*PH*PW, Kp), K zero-padded to 128*k.
# Assumes even conv-output sizes (true for the 32x32 LeNet shapes), matching
# PyTorch's floor pooling there.
# TODO(synk): at large batch, pull this patch extraction (and ideally
# conv2 + the fc stack) inside one kernel per batch tile with manual DMA to
# avoid the kh*kw im2col HBM blow-up and the inter-kernel activation traffic.
# ----------------------------------------------------------------------------
def _im2col_pool_phases(x_nhwc, kh, kw, k_pad):
    B, H, W, C = x_nhwc.shape
    oh, ow = H - kh + 1, W - kw + 1
    ph, pw = oh // 2, ow // 2
    patches = [x_nhwc[:, i:i + oh, j:j + ow, :]
               for i in range(kh) for j in range(kw)]
    cols = jnp.concatenate(patches, axis=-1)          # (B, oh, ow, kh*kw*C)
    K = kh * kw * C
    if k_pad > K:
        cols = jnp.pad(cols, ((0, 0), (0, 0), (0, 0), (0, k_pad - K)))
    cols = cols.astype(MXU_DTYPE)
    phases = jnp.stack(
        [cols[:, dy::2, dx::2, :].reshape(B * ph * pw, k_pad)
         for dy in (0, 1) for dx in (0, 1)], axis=0)  # (4, B*ph*pw, k_pad)
    return phases, ph, pw


# ----------------------------------------------------------------------------
# Parameters: PyTorch-default-style init, then one-time layout/pad prep.
# ----------------------------------------------------------------------------
def init_params(key):
    def u(k, shape, fan_in):
        bound = 1.0 / float(fan_in) ** 0.5
        return jax.random.uniform(k, shape, jnp.float32, -bound, bound)

    ks = jax.random.split(key, 10)
    return {
        "conv1_w": u(ks[0], (6, 3, 5, 5), 3 * 5 * 5),
        "conv1_b": u(ks[1], (6,), 3 * 5 * 5),
        "conv2_w": u(ks[2], (16, 6, 5, 5), 6 * 5 * 5),
        "conv2_b": u(ks[3], (16,), 6 * 5 * 5),
        "fc1_w": u(ks[4], (120, 16 * 5 * 5), 16 * 5 * 5),
        "fc1_b": u(ks[5], (120,), 16 * 5 * 5),
        "fc2_w": u(ks[6], (84, 120), 120),
        "fc2_b": u(ks[7], (84,), 120),
        "fc3_w": u(ks[8], (10, 84), 84),
        "fc3_b": u(ks[9], (10,), 84),
    }


def prepare_params(p):
    """One-time transpose / zero-pad to the lane-dense layouts the kernels use."""
    def pad_to(a, shape):
        z = jnp.zeros(shape, a.dtype)
        return z.at[tuple(slice(0, s) for s in a.shape)].set(a)

    def conv_w(w, cin_pad, k_pad):         # (Cout,Cin,kh,kw) -> (Kp, 128)
        cout, cin, kh, kw = w.shape
        w2 = jnp.transpose(w, (2, 3, 1, 0))                # (kh,kw,cin,cout)
        w2 = pad_to(w2, (kh, kw, cin_pad, cout))
        w2 = w2.reshape(kh * kw * cin_pad, cout)
        return pad_to(w2, (k_pad, LANE)).astype(MXU_DTYPE)

    def fc_w(w):                           # (out, in) -> (128, 128)
        return pad_to(jnp.transpose(w), (LANE, LANE)).astype(MXU_DTYPE)

    def bias_pad(b):
        return pad_to(b.reshape(1, -1), (1, LANE)).astype(jnp.float32)

    # fc1 columns reordered from PyTorch (C,H,W) flatten to the (H,W,Cpad=128)
    # order of the padded conv2 output, so fc1 consumes it with zero repack.
    w1 = p["fc1_w"].reshape(120, 16, 5, 5).transpose(2, 3, 1, 0)  # (5,5,16,120)
    w1p = jnp.zeros((5, 5, LANE, LANE), jnp.float32)
    w1p = w1p.at[:, :, :16, :120].set(w1).reshape(5 * 5 * LANE, LANE)

    return {
        # conv1: per-tap Cin=3 (raw image), K = 75 -> 128
        "conv1_w": conv_w(p["conv1_w"], 3, _round_up(5 * 5 * 3, LANE)),
        "conv1_b": bias_pad(p["conv1_b"]),
        # conv2: per-tap Cin padded to 8 so the inter-conv slice stays aligned,
        # K = 200 -> 256
        "conv2_w": conv_w(p["conv2_w"], CONV2_CIN_PAD,
                          _round_up(5 * 5 * CONV2_CIN_PAD, LANE)),
        "conv2_b": bias_pad(p["conv2_b"]),
        "fc1_w": w1p.astype(MXU_DTYPE), "fc1_b": bias_pad(p["fc1_b"]),
        "fc2_w": fc_w(p["fc2_w"]),      "fc2_b": bias_pad(p["fc2_b"]),
        "fc3_w": fc_w(p["fc3_w"]),      "fc3_b": bias_pad(p["fc3_b"]),
    }


# ----------------------------------------------------------------------------
# Forward pass (matches Net.forward; x is NCHW like PyTorch)
# ----------------------------------------------------------------------------
def net_forward(p, x):
    B = x.shape[0]
    x = jnp.transpose(x, (0, 2, 3, 1))                    # NHWC (B,32,32,3)

    # conv1(3->6,5x5) + bias + ReLU + 2x2 pool, fused; batch flattened into M.
    cols, ph, pw = _im2col_pool_phases(x, 5, 5, p["conv1_w"].shape[0])
    h = conv_relu_pool(cols, p["conv1_w"], p["conv1_b"])  # (B*196, 128) bf16
    # keep 8 channels (6 real + 2 exact-zero) so downstream slices stay
    # (8,128)-aligned; conv2's weight rows are padded to match.
    h = h.reshape(B, ph, pw, LANE)[..., :CONV2_CIN_PAD]   # (B, 14, 14, 8)

    # conv2(6->16,5x5) + bias + ReLU + 2x2 pool, fused.
    cols, ph, pw = _im2col_pool_phases(h, 5, 5, p["conv2_w"].shape[0])
    h = conv_relu_pool(cols, p["conv2_w"], p["conv2_b"])  # (B*25, 128) bf16

    # fc1+fc2+fc3 fused; consumes the channel-padded conv2 output directly.
    h = h.reshape(B, 25 * LANE)                           # (B, 3200) bf16
    out = fc_stack(h, p["fc1_w"], p["fc1_b"], p["fc2_w"], p["fc2_b"],
                   p["fc3_w"], p["fc3_b"])                # (B, 128) f32
    return out[:, :10]


if __name__ == "__main__":
    key = jax.random.PRNGKey(0)
    pkey, xkey = jax.random.split(key)
    params = prepare_params(init_params(pkey))
    # Net implies 3x32x32 inputs: 32 ->conv5-> 28 ->pool-> 14 ->conv5-> 10
    # ->pool-> 5, and 16*5*5 = 400 feeds fc1.
    x = jax.random.normal(xkey, (2, 3, 32, 32), dtype=jnp.float32)
    fwd = jax.jit(net_forward)
    out = jax.block_until_ready(fwd(params, x))
    assert out.shape == (2, 10) and out.dtype == jnp.float32
    print("KERNEL_OK")
</pallas_src>

<mosaic_0001>
module attributes {stable_mosaic.version = 11 : i64} {
  func.func @_conv_relu_pool_kernel(%arg0: i32, %arg1: memref<800x128xbf16, #tpu.memory_space<vmem>>, %arg2: memref<128x128xbf16, #tpu.memory_space<vmem>>, %arg3: memref<1x128xf32, #tpu.memory_space<vmem>>, %arg4: memref<200x128xbf16, #tpu.memory_space<vmem>>) attributes {dimension_semantics = [#tpu.dimension_semantics<parallel>], iteration_bounds = array<i64: 2>, scalar_prefetch = 0 : i64, scratch_operands = 0 : i64, tpu.core_type = #tpu.core_type<tc>, window_params = [{transform_indices = @transform_0, window_bounds = array<i64: 800, 128>}, {pipeline_mode = #tpu.pipeline_mode<synchronous>, transform_indices = @transform_1, window_bounds = array<i64: 128, 128>}, {pipeline_mode = #tpu.pipeline_mode<synchronous>, transform_indices = @transform_2, window_bounds = array<i64: 1, 128>}, {transform_indices = @transform_3, window_bounds = array<i64: 200, 128>}]} {
    %c0 = arith.constant 0 : index
    %c0_0 = arith.constant 0 : index
    %0 = vector.load %arg1[%c0, %c0_0] : memref<800x128xbf16, #tpu.memory_space<vmem>>, vector<800x128xbf16>
    %c0_1 = arith.constant 0 : index
    %c0_2 = arith.constant 0 : index
    %1 = vector.load %arg2[%c0_1, %c0_2] : memref<128x128xbf16, #tpu.memory_space<vmem>>, vector<128x128xbf16>
    %cst = arith.constant dense<0.000000e+00> : vector<800x128xf32>
    %2 = tpu.matmul %0, %1, %cst {dimension_numbers = #tpu.dot_dimension_numbers<[1], [0], [0], [1], [0, 0, 1, 1], [], []>} : vector<800x128xbf16>, vector<128x128xbf16>, vector<800x128xf32> -> vector<800x128xf32>
    %3 = vector.extract_strided_slice %2 {offsets = [0, 0], sizes = [200, 128], strides = [1, 1]} : vector<800x128xf32> to vector<200x128xf32>
    %4 = vector.extract_strided_slice %2 {offsets = [200, 0], sizes = [200, 128], strides = [1, 1]} : vector<800x128xf32> to vector<200x128xf32>
    %5 = arith.maximumf %3, %4 : vector<200x128xf32>
    %6 = vector.extract_strided_slice %2 {offsets = [400, 0], sizes = [200, 128], strides = [1, 1]} : vector<800x128xf32> to vector<200x128xf32>
    %7 = vector.extract_strided_slice %2 {offsets = [600, 0], sizes = [200, 128], strides = [1, 1]} : vector<800x128xf32> to vector<200x128xf32>
    %8 = arith.maximumf %6, %7 : vector<200x128xf32>
    %9 = arith.maximumf %5, %8 : vector<200x128xf32>
    %c0_3 = arith.constant 0 : index
    %c0_4 = arith.constant 0 : index
    %10 = vector.load %arg3[%c0_3, %c0_4] : memref<1x128xf32, #tpu.memory_space<vmem>>, vector<1x128xf32>
    %11 = vector.broadcast %10 : vector<1x128xf32> to vector<200x128xf32>
    %12 = arith.addf %9, %11 : vector<200x128xf32>
    %cst_5 = arith.constant 0.000000e+00 : f32
    %13 = vector.broadcast %cst_5 : f32 to vector<200x128xf32>
    %14 = arith.maximumf %12, %13 : vector<200x128xf32>
    %15 = arith.truncf %14 : vector<200x128xf32> to vector<200x128xbf16>
    %c0_6 = arith.constant 0 : index
    %c0_7 = arith.constant 0 : index
    %16 = vector.load %arg4[%c0_6, %c0_7] : memref<200x128xbf16, #tpu.memory_space<vmem>>, vector<200x128xbf16>
    tpu.vector_store %arg4[%c0_6, %c0_7], %15 {strides = array<i32>} : memref<200x128xbf16, #tpu.memory_space<vmem>>, vector<200x128xbf16>,
    return
  }
  func.func @transform_0(%arg0: i32) -> (i32, i32) {
    %c0_i32 = arith.constant 0 : i32
    %c0_i32_0 = arith.constant 0 : i32
    return %arg0, %c0_i32 : i32, i32
  }
  func.func @transform_1(%arg0: i32) -> (i32, i32) {
    %c0_i32 = arith.constant 0 : i32
    %c0_i32_0 = arith.constant 0 : i32
    %c0_i32_1 = arith.constant 0 : i32
    return %c0_i32, %c0_i32_0 : i32, i32
  }
  func.func @transform_2(%arg0: i32) -> (i32, i32) {
    %c0_i32 = arith.constant 0 : i32
    %c0_i32_0 = arith.constant 0 : i32
    %c0_i32_1 = arith.constant 0 : i32
    return %c0_i32, %c0_i32_0 : i32, i32
  }
  func.func @transform_3(%arg0: i32) -> (i32, i32) {
    %c0_i32 = arith.constant 0 : i32
    %c0_i32_0 = arith.constant 0 : i32
    return %arg0, %c0_i32 : i32, i32
  }
}

module attributes {stable_mosaic.version = 11 : i64} {
  func.func @_conv_relu_pool_kernel(%arg0: i32, %arg1: memref<224x256xbf16, #tpu.memory_space<vmem>>, %arg2: memref<256x128xbf16, #tpu.memory_space<vmem>>, %arg3: memref<1x128xf32, #tpu.memory_space<vmem>>, %arg4: memref<56x128xbf16, #tpu.memory_space<vmem>>) attributes {dimension_semantics = [#tpu.dimension_semantics<parallel>], iteration_bounds = array<i64: 1>, scalar_prefetch = 0 : i64, scratch_operands = 0 : i64, tpu.core_type = #tpu.core_type<tc>, window_params = [{transform_indices = @transform_0, window_bounds = array<i64: 224, 256>}, {pipeline_mode = #tpu.pipeline_mode<synchronous>, transform_indices = @transform_1, window_bounds = array<i64: 256, 128>}, {pipeline_mode = #tpu.pipeline_mode<synchronous>, transform_indices = @transform_2, window_bounds = array<i64: 1, 128>}, {transform_indices = @transform_3, window_bounds = array<i64: 56, 128>}]} {
    %c0 = arith.constant 0 : index
    %c0_0 = arith.constant 0 : index
    %0 = vector.load %arg1[%c0, %c0_0] : memref<224x256xbf16, #tpu.memory_space<vmem>>, vector<224x256xbf16>
    %c0_1 = arith.constant 0 : index
    %c0_2 = arith.constant 0 : index
    %1 = vector.load %arg2[%c0_1, %c0_2] : memref<256x128xbf16, #tpu.memory_space<vmem>>, vector<256x128xbf16>
    %cst = arith.constant dense<0.000000e+00> : vector<224x128xf32>
    %2 = tpu.matmul %0, %1, %cst {dimension_numbers = #tpu.dot_dimension_numbers<[1], [0], [0], [1], [0, 0, 1, 1], [], []>} : vector<224x256xbf16>, vector<256x128xbf16>, vector<224x128xf32> -> vector<224x128xf32>
    %3 = vector.extract_strided_slice %2 {offsets = [0, 0], sizes = [56, 128], strides = [1, 1]} : vector<224x128xf32> to vector<56x128xf32>
    %4 = vector.extract_strided_slice %2 {offsets = [56, 0], sizes = [56, 128], strides = [1, 1]} : vector<224x128xf32> to vector<56x128xf32>
    %5 = arith.maximumf %3, %4 : vector<56x128xf32>
    %6 = vector.extract_strided_slice %2 {offsets = [112, 0], sizes = [56, 128], strides = [1, 1]} : vector<224x128xf32> to vector<56x128xf32>
    %7 = vector.extract_strided_slice %2 {offsets = [168, 0], sizes = [56, 128], strides = [1, 1]} : vector<224x128xf32> to vector<56x128xf32>
    %8 = arith.maximumf %6, %7 : vector<56x128xf32>
    %9 = arith.maximumf %5, %8 : vector<56x128xf32>
    %c0_3 = arith.constant 0 : index
    %c0_4 = arith.constant 0 : index
    %10 = vector.load %arg3[%c0_3, %c0_4] : memref<1x128xf32, #tpu.memory_space<vmem>>, vector<1x128xf32>
    %11 = vector.broadcast %10 : vector<1x128xf32> to vector<56x128xf32>
    %12 = arith.addf %9, %11 : vector<56x128xf32>
    %cst_5 = arith.constant 0.000000e+00 : f32
    %13 = vector.broadcast %cst_5 : f32 to vector<56x128xf32>
    %14 = arith.maximumf %12, %13 : vector<56x128xf32>
    %15 = arith.truncf %14 : vector<56x128xf32> to vector<56x128xbf16>
    %c0_6 = arith.constant 0 : index
    %c0_7 = arith.constant 0 : index
    %16 = vector.load %arg4[%c0_6, %c0_7] : memref<56x128xbf16, #tpu.memory_space<vmem>>, vector<56x128xbf16>
    tpu.vector_store %arg4[%c0_6, %c0_7], %15 {strides = array<i32>} : memref<56x128xbf16, #tpu.memory_space<vmem>>, vector<56x128xbf16>,
    return
  }
  func.func @transform_0(%arg0: i32) -> (i32, i32) {
    %c0_i32 = arith.constant 0 : i32
    %c0_i32_0 = arith.constant 0 : i32
    return %arg0, %c0_i32 : i32, i32
  }
  func.func @transform_1(%arg0: i32) -> (i32, i32) {
    %c0_i32 = arith.constant 0 : i32
    %c0_i32_0 = arith.constant 0 : i32
    %c0_i32_1 = arith.constant 0 : i32
    return %c0_i32, %c0_i32_0 : i32, i32
  }
  func.func @transform_2(%arg0: i32) -> (i32, i32) {
    %c0_i32 = arith.constant 0 : i32
    %c0_i32_0 = arith.constant 0 : i32
    %c0_i32_1 = arith.constant 0 : i32
    return %c0_i32, %c0_i32_0 : i32, i32
  }
  func.func @transform_3(%arg0: i32) -> (i32, i32) {
    %c0_i32 = arith.constant 0 : i32
    %c0_i32_0 = arith.constant 0 : i32
    return %arg0, %c0_i32 : i32, i32
  }
}

module attributes {stable_mosaic.version = 11 : i64} {
  func.func @_fc_stack_kernel(%arg0: i32, %arg1: memref<8x3200xbf16, #tpu.memory_space<vmem>>, %arg2: memref<3200x128xbf16, #tpu.memory_space<vmem>>, %arg3: memref<1x128xf32, #tpu.memory_space<vmem>>, %arg4: memref<128x128xbf16, #tpu.memory_space<vmem>>, %arg5: memref<1x128xf32, #tpu.memory_space<vmem>>, %arg6: memref<128x128xbf16, #tpu.memory_space<vmem>>, %arg7: memref<1x128xf32, #tpu.memory_space<vmem>>, %arg8: memref<8x128xf32, #tpu.memory_space<vmem>>) attributes {dimension_semantics = [#tpu.dimension_semantics<parallel>], iteration_bounds = array<i64: 1>, scalar_prefetch = 0 : i64, scratch_operands = 0 : i64, tpu.core_type = #tpu.core_type<tc>, window_params = [{transform_indices = @transform_0, window_bounds = array<i64: 8, 3200>}, {pipeline_mode = #tpu.pipeline_mode<synchronous>, transform_indices = @transform_1, window_bounds = array<i64: 3200, 128>}, {pipeline_mode = #tpu.pipeline_mode<synchronous>, transform_indices = @transform_2, window_bounds = array<i64: 1, 128>}, {pipeline_mode = #tpu.pipeline_mode<synchronous>, transform_indices = @transform_3, window_bounds = array<i64: 128, 128>}, {pipeline_mode = #tpu.pipeline_mode<synchronous>, transform_indices = @transform_4, window_bounds = array<i64: 1, 128>}, {pipeline_mode = #tpu.pipeline_mode<synchronous>, transform_indices = @transform_5, window_bounds = array<i64: 128, 128>}, {pipeline_mode = #tpu.pipeline_mode<synchronous>, transform_indices = @transform_6, window_bounds = array<i64: 1, 128>}, {transform_indices = @transform_7, window_bounds = array<i64: 8, 128>}]} {
    %c0 = arith.constant 0 : index
    %c0_0 = arith.constant 0 : index
    %0 = vector.load %arg1[%c0, %c0_0] : memref<8x3200xbf16, #tpu.memory_space<vmem>>, vector<8x3200xbf16>
    %c0_1 = arith.constant 0 : index
    %c0_2 = arith.constant 0 : index
    %1 = vector.load %arg2[%c0_1, %c0_2] : memref<3200x128xbf16, #tpu.memory_space<vmem>>, vector<3200x128xbf16>
    %cst = arith.constant dense<0.000000e+00> : vector<8x128xf32>
    %2 = tpu.matmul %0, %1, %cst {dimension_numbers = #tpu.dot_dimension_numbers<[1], [0], [0], [1], [0, 0, 1, 1], [], []>} : vector<8x3200xbf16>, vector<3200x128xbf16>, vector<8x128xf32> -> vector<8x128xf32>
    %c0_3 = arith.constant 0 : index
    %c0_4 = arith.constant 0 : index
    %3 = vector.load %arg3[%c0_3, %c0_4] : memref<1x128xf32, #tpu.memory_space<vmem>>, vector<1x128xf32>
    %4 = vector.broadcast %3 : vector<1x128xf32> to vector<8x128xf32>
    %5 = arith.addf %2, %4 : vector<8x128xf32>
    %cst_5 = arith.constant 0.000000e+00 : f32
    %6 = vector.broadcast %cst_5 : f32 to vector<8x128xf32>
    %7 = arith.maximumf %5, %6 : vector<8x128xf32>
    %8 = arith.truncf %7 : vector<8x128xf32> to vector<8x128xbf16>
    %c0_6 = arith.constant 0 : index
    %c0_7 = arith.constant 0 : index
    %9 = vector.load %arg4[%c0_6, %c0_7] : memref<128x128xbf16, #tpu.memory_space<vmem>>, vector<128x128xbf16>
    %cst_8 = arith.constant dense<0.000000e+00> : vector<8x128xf32>
    %10 = tpu.matmul %8, %9, %cst_8 {dimension_numbers = #tpu.dot_dimension_numbers<[1], [0], [0], [1], [0, 0, 1, 1], [], []>} : vector<8x128xbf16>, vector<128x128xbf16>, vector<8x128xf32> -> vector<8x128xf32>
    %c0_9 = arith.constant 0 : index
    %c0_10 = arith.constant 0 : index
    %11 = vector.load %arg5[%c0_9, %c0_10] : memref<1x128xf32, #tpu.memory_space<vmem>>, vector<1x128xf32>
    %12 = vector.broadcast %11 : vector<1x128xf32> to vector<8x128xf32>
    %13 = arith.addf %10, %12 : vector<8x128xf32>
    %cst_11 = arith.constant 0.000000e+00 : f32
    %14 = vector.broadcast %cst_11 : f32 to vector<8x128xf32>
    %15 = arith.maximumf %13, %14 : vector<8x128xf32>
    %16 = arith.truncf %15 : vector<8x128xf32> to vector<8x128xbf16>
    %c0_12 = arith.constant 0 : index
    %c0_13 = arith.constant 0 : index
    %17 = vector.load %arg6[%c0_12, %c0_13] : memref<128x128xbf16, #tpu.memory_space<vmem>>, vector<128x128xbf16>
    %cst_14 = arith.constant dense<0.000000e+00> : vector<8x128xf32>
    %18 = tpu.matmul %16, %17, %cst_14 {dimension_numbers = #tpu.dot_dimension_numbers<[1], [0], [0], [1], [0, 0, 1, 1], [], []>} : vector<8x128xbf16>, vector<128x128xbf16>, vector<8x128xf32> -> vector<8x128xf32>
    %c0_15 = arith.constant 0 : index
    %c0_16 = arith.constant 0 : index
    %19 = vector.load %arg7[%c0_15, %c0_16] : memref<1x128xf32, #tpu.memory_space<vmem>>, vector<1x128xf32>
    %20 = vector.broadcast %19 : vector<1x128xf32> to vector<8x128xf32>
    %21 = arith.addf %18, %20 : vector<8x128xf32>
    %c0_17 = arith.constant 0 : index
    %c0_18 = arith.constant 0 : index
    %22 = vector.load %arg8[%c0_17, %c0_18] : memref<8x128xf32, #tpu.memory_space<vmem>>, vector<8x128xf32>
    tpu.vector_store %arg8[%c0_17, %c0_18], %21 {strides = array<i32>} : memref<8x128xf32, #tpu.memory_space<vmem>>, vector<8x128xf32>,
    return
  }
  func.func @transform_0(%arg0: i32) -> (i32, i32) {
    %c0_i32 = arith.constant 0 : i32
    %c0_i32_0 = arith.constant 0 : i32
    return %arg0, %c0_i32 : i32, i32
  }
  func.func @transform_1(%arg0: i32) -> (i32, i32) {
    %c0_i32 = arith.constant 0 : i32
    %c0_i32_0 = arith.constant 0 : i32
    %c0_i32_1 = arith.constant 0 : i32
    return %c0_i32, %c0_i32_0 : i32, i32
  }
  func.func @transform_2(%arg0: i32) -> (i32, i32) {
    %c0_i32 = arith.constant 0 : i32
    %c0_i32_0 = arith.constant 0 : i32
    %c0_i32_1 = arith.constant 0 : i32
    return %c0_i32, %c0_i32_0 : i32, i32
  }
  func.func @transform_3(%arg0: i32) -> (i32, i32) {
    %c0_i32 = arith.constant 0 : i32
    %c0_i32_0 = arith.constant 0 : i32
    %c0_i32_1 = arith.constant 0 : i32
    return %c0_i32, %c0_i32_0 : i32, i32
  }
  func.func @transform_4(%arg0: i32) -> (i32, i32) {
    %c0_i32 = arith.constant 0 : i32
    %c0_i32_0 = arith.constant 0 : i32
    %c0_i32_1 = arith.constant 0 : i32
    return %c0_i32, %c0_i32_0 : i32, i32
  }
  func.func @transform_5(%arg0: i32) -> (i32, i32) {
    %c0_i32 = arith.constant 0 : i32
    %c0_i32_0 = arith.constant 0 : i32
    %c0_i32_1 = arith.constant 0 : i32
    return %c0_i32, %c0_i32_0 : i32, i32
  }
  func.func @transform_6(%arg0: i32) -> (i32, i32) {
    %c0_i32 = arith.constant 0 : i32
    %c0_i32_0 = arith.constant 0 : i32
    %c0_i32_1 = arith.constant 0 : i32
    return %c0_i32, %c0_i32_0 : i32, i32
  }
  func.func @transform_7(%arg0: i32) -> (i32, i32) {
    %c0_i32 = arith.constant 0 : i32
    %c0_i32_0 = arith.constant 0 : i32
    return %arg0, %c0_i32 : i32, i32
  }
}

</mosaic_0001>

<bundles_post_ra>
// kernel: net_forward.3
= control target key start
LH: loop header
LB: loop body
LE: loop exit
PB: predicated region body
PF: predicated region fallthrough
CT: control target
= control target key end

     0   :  { %s1859_s12 = smov 0   ;;  %s2151_s0 = inlined_call_operand.vmem [shape: bf16[1600,128], index: 0, kind: input, shape index: {}]   ;;  %s2152_s1 = inlined_call_operand.vmem [shape: bf16[128,128], index: 1, kind: input, shape index: {}]   ;;  %s2153_s2 = inlined_call_operand.vmem [shape: f32[1,128], index: 2, kind: input, shape index: {}]   ;;  %s2154_s3 = inlined_call_operand.vmem [shape: bf16[400,128], index: 3, kind: output, shape index: {}]  }
   0x1 LB: > { %s1386_s13 = sadd.s32 4294967295, %s1837_s12   ;;  %p1390_p0 = scmp.ge.s32.totalorder %s1837_s12, 1  ;;  %s1837_s12 = sphi %s1859_s12, %s13_s12  }
   0x2   : > { %p138_p1 = scmp.lt.s32.totalorder %s1837_s12, 3 }
   0x4   : > { %p139_p2 = pnand %p1390_p0, %p138_p1 }
   0x6   : > { %142 = sbr.rel (%p139_p2) target bundleno = 350 (0x15e), region = 32 }
   0xb   : > { %v1773_v0 = vld [vmem:[%s2152_s1 + $0x38] sm:$0xff]   ;;  %s162_s16 = smul.u32 100, %s1386_s13  ;;  %v1774_v1 = vld [vmem:[%s2152_s1 + $0x30] sm:$0xff]   ;;  %v1775_v2 = vld [vmem:[%s2152_s1 + $0x28] sm:$0xff]  }
   0xc   : > { %1633 = vmatprep.subr.bf16.mxu0 %v1773_v0  ;;  %1749 = vmatprep.subr.bf16.mxu1 %v1773_v0  ;;  %v1776_v3 = vld [vmem:[%s2152_s1 + $0x20] sm:$0xff]   ;;  %v1777_v6 = vld [vmem:[%s2152_s1 + $0x18] sm:$0xff]   ;;  %v1778_v7 = vld [vmem:[%s2152_s1 + $0x10] sm:$0xff]   ;;  %s168_s8 = smul.u32 25, %s1386_s13 }
   0xd   : > { %p163_p3 = scmp.lt.s32.totalorder %s162_s16, 199  ;;  %1634 = vmatpush3.bf16.msra.mxu0 %v1773_v0  ;;  %1757 = vmatpush3.bf16.msra.mxu1 %v1773_v0  ;;  %v1779_v8 = vld [vmem:[%s2152_s1 + $0x8] sm:$0xff]   ;;  %v1780_v9 = vld [vmem:[%s2152_s1] sm:$0xff]  }
   0xe   : > { %1635 = vmatprep.subr.bf16.mxu0 %v1774_v1  ;;  %1750 = vmatprep.subr.bf16.mxu1 %v1774_v1  ;;  %p169_p4 = scmp.lt.s32.totalorder %s168_s8, 49 }
   0xf   : > { %s2170_s16 = smov (!%p163_p3, %s162_s16), 199 }
  0x10   : > { %s1391_s21 = sshll.u32 %s2170_s16, 2  ;;  %s2172_s8 = smov (!%p169_p4, %s168_s8), 49 }
  0x11   : > { %1636 = vmatpush3.bf16.msra.mxu0 %v1774_v1  ;;  %1758 = vmatpush3.bf16.msra.mxu1 %v1774_v1  ;;  %s1884_s26 = scalar_lea.vmem %s2151_s0, %s1391_s21  ;;  %s1392_s11 = sshll.u32 %s2172_s8, 2 }
  0x12   : > { %1637 = vmatprep.subr.bf16.mxu0 %v1775_v2  ;;  %1751 = vmatprep.subr.bf16.mxu1 %v1775_v2  ;;  %v1781_v4 = vld [vmem:[%s1884_s26] sm:$0xff]   ;;  %v1782_v5 = vld [vmem:[%s1884_s26 + $0xd0] sm:$0xff]   ;;  %v1783_v10 = vld [vmem:[%s1884_s26 + $0x8] sm:$0xff]   ;;  %s2069_s15 = scalar_lea.vmem %s2154_s3, %s1392_s11 }
  0x13   : > { %1649 = vmatprep.mubr.bf16.mxu0 %v1781_v4  ;;  %1701 = vmatprep.mubr.bf16.mxu1 %v1782_v5  ;;  %v1784_v11 = vld [vmem:[%s1884_s26 + $0xd8] sm:$0xff]   ;;  %v1785_v12 = vld [vmem:[%s1884_s26 + $0x10] sm:$0xff]   ;;  %v1786_v13 = vld [vmem:[%s1884_s26 + $0xe0] sm:$0xff]  }
  0x14   : > { %v1787_v14 = vld [vmem:[%s1884_s26 + $0x18] sm:$0xff]   ;;  %v1788_v15 = vld [vmem:[%s1884_s26 + $0xe8] sm:$0xff]   ;;  %v1789_v16 = vld [vmem:[%s1884_s26 + $0x20] sm:$0xff]  }
  0x15   : > { %1638 = vmatpush3.bf16.msra.mxu0 %v1775_v2  ;;  %1759 = vmatpush3.bf16.msra.mxu1 %v1775_v2  ;;  %v1790_v17 = vld [vmem:[%s1884_s26 + $0xf0] sm:$0xff]   ;;  %v1791_v18 = vld [vmem:[%s1884_s26 + $0x28] sm:$0xff]   ;;  %v1792_v19 = vld [vmem:[%s1884_s26 + $0xf8] sm:$0xff]  }
  0x16   : > { %1639 = vmatprep.subr.bf16.mxu0 %v1776_v3  ;;  %1752 = vmatprep.subr.bf16.mxu1 %v1776_v3  ;;  %v1793_v20 = vld [vmem:[%s1884_s26 + $0x30] sm:$0xff]   ;;  %v1794_v21 = vld [vmem:[%s1884_s26 + $0x100] sm:$0xff]   ;;  %v1795_v22 = vld [vmem:[%s1884_s26 + $0x38] sm:$0xff]  }
  0x17   : > { %v1796_v23 = vld [vmem:[%s1884_s26 + $0x108] sm:$0xff]   ;;  %v1797_v24 = vld [vmem:[%s1884_s26 + $0x40] sm:$0xff]   ;;  %v1798_v25 = vld [vmem:[%s1884_s26 + $0x110] sm:$0xff]  }
  0x18   : > { %v1799_v26 = vld [vmem:[%s1884_s26 + $0x48] sm:$0xff]   ;;  %v1800_v27 = vld [vmem:[%s1884_s26 + $0x118] sm:$0xff]   ;;  %v1801_v28 = vld [vmem:[%s1884_s26 + $0x50] sm:$0xff]  }
  0x19   : > { %1640 = vmatpush3.bf16.msra.mxu0 %v1776_v3  ;;  %1760 = vmatpush3.bf16.msra.mxu1 %v1776_v3  ;;  %v1802_v29 = vld [vmem:[%s1884_s26 + $0x120] sm:$0xff]   ;;  %v1803_v30 = vld [vmem:[%s1884_s26 + $0x58] sm:$0xff]   ;;  %v1804_v31 = vld [vmem:[%s1884_s26 + $0x128] sm:$0xff]  }
  0x1a   : > { %1641 = vmatprep.subr.bf16.mxu0 %v1777_v6  ;;  %1753 = vmatprep.subr.bf16.mxu1 %v1777_v6  ;;  %v1805_v32 = vld [vmem:[%s1884_s26 + $0x60] sm:$0xff]   ;;  %v1806_v33 = vld [vmem:[%s1884_s26 + $0x130] sm:$0xff]   ;;  %v1807_v34 = vld [vmem:[%s1884_s26 + $0x68] sm:$0xff]  }
  0x1b   : > { %v1808_v35 = vld [vmem:[%s1884_s26 + $0x138] sm:$0xff]   ;;  %v1809_v36 = vld [vmem:[%s1884_s26 + $0x70] sm:$0xff]   ;;  %v1810_v37 = vld [vmem:[%s1884_s26 + $0x140] sm:$0xff]  }
  0x1c   : > { %v1811_v38 = vld [vmem:[%s1884_s26 + $0x78] sm:$0xff]   ;;  %v1812_v39 = vld [vmem:[%s1884_s26 + $0x148] sm:$0xff]   ;;  %v1813_v40 = vld [vmem:[%s1884_s26 + $0x80] sm:$0xff]  }
  0x1d   : > { %1642 = vmatpush3.bf16.msra.mxu0 %v1777_v6  ;;  %1761 = vmatpush3.bf16.msra.mxu1 %v1777_v6  ;;  %v1814_v41 = vld [vmem:[%s1884_s26 + $0x150] sm:$0xff]   ;;  %v1815_v42 = vld [vmem:[%s1884_s26 + $0x88] sm:$0xff]   ;;  %v1816_v43 = vld [vmem:[%s1884_s26 + $0x158] sm:$0xff]  }
  0x1e   : > { %1643 = vmatprep.subr.bf16.mxu0 %v1778_v7  ;;  %1754 = vmatprep.subr.bf16.mxu1 %v1778_v7  ;;  %v1817_v44 = vld [vmem:[%s1884_s26 + $0x90] sm:$0xff]   ;;  %v1818_v45 = vld [vmem:[%s1884_s26 + $0x160] sm:$0xff]   ;;  %v1819_v46 = vld [vmem:[%s1884_s26 + $0x98] sm:$0xff]  }
  0x1f   : > { %v1820_v47 = vld [vmem:[%s1884_s26 + $0x168] sm:$0xff]   ;;  %v1821_v48 = vld [vmem:[%s1884_s26 + $0xa0] sm:$0xff]   ;;  %v1822_v49 = vld [vmem:[%s1884_s26 + $0x170] sm:$0xff]  }
  0x20   : > { %v1823_v50 = vld [vmem:[%s1884_s26 + $0xa8] sm:$0xff]   ;;  %v1824_v51 = vld [vmem:[%s1884_s26 + $0x178] sm:$0xff]   ;;  %v1825_v52 = vld [vmem:[%s1884_s26 + $0xb0] sm:$0xff]  }
  0x21   : > { %1644 = vmatpush3.bf16.msra.mxu0 %v1778_v7  ;;  %1762 = vmatpush3.bf16.msra.mxu1 %v1778_v7  ;;  %v1826_v53 = vld [vmem:[%s1884_s26 + $0x180] sm:$0xff]   ;;  %v1827_v54 = vld [vmem:[%s1884_s26 + $0xb8] sm:$0xff]   ;;  %v1828_v55 = vld [vmem:[%s1884_s26 + $0x188] sm:$0xff]  }
  0x22   : > { %1645 = vmatprep.subr.bf16.mxu0 %v1779_v8  ;;  %1755 = vmatprep.subr.bf16.mxu1 %v1779_v8  ;;  %v1829_v56 = vld [vmem:[%s1884_s26 + $0xc0] sm:$0xff]   ;;  %v1830_v57 = vld [vmem:[%s1884_s26 + $0xc8] sm:$0xff]  }
  0x25   : > { %1646 = vmatpush3.bf16.msra.mxu0 %v1779_v8  ;;  %1763 = vmatpush3.bf16.msra.mxu1 %v1779_v8 }
  0x26   : > { %1647 = vmatprep.subr.bf16.mxu0 %v1780_v9  ;;  %1756 = vmatprep.subr.bf16.mxu1 %v1780_v9 }
  0x29   : > { %1648 = vmatpush3.bf16.msra.mxu0 %v1780_v9  ;;  %1764 = vmatpush3.bf16.msra.mxu1 %v1780_v9 }
  0x2c   : > { %1650 = vmatmul.mubr.bf16.vlgmr.msra.gmra.mxu0 %v1783_v10  ;;  %1702 = vmatmul.mubr.bf16.vlgmr.msra.gmra.mxu1 %v1784_v11 }
  0x2d   : > { %1653 = vmatprep.mubr.bf16.mxu0 %v1785_v12  ;;  %1705 = vmatprep.mubr.bf16.mxu1 %v1786_v13 }
  0x34   : > { %1654 = vmatmul.mubr.bf16.gmra.mxu0 %v1787_v14  ;;  %1706 = vmatmul.mubr.bf16.gmra.mxu1 %v1788_v15 }
  0x35   : > { %1657 = vmatprep.mubr.bf16.mxu0 %v1789_v16  ;;  %1709 = vmatprep.mubr.bf16.mxu1 %v1790_v17 }
  0x3c   : > { %1658 = vmatmul.mubr.bf16.gmra.mxu0 %v1791_v18  ;;  %1710 = vmatmul.mubr.bf16.gmra.mxu1 %v1792_v19 }
  0x3d   : > { %1661 = vmatprep.mubr.bf16.mxu0 %v1793_v20  ;;  %1713 = vmatprep.mubr.bf16.mxu1 %v1794_v21 }
  0x44   : > { %1662 = vmatmul.mubr.bf16.gmra.mxu0 %v1795_v22  ;;  %1714 = vmatmul.mubr.bf16.gmra.mxu1 %v1796_v23 }
  0x45   : > { %1665 = vmatprep.mubr.bf16.mxu0 %v1797_v24  ;;  %1717 = vmatprep.mubr.bf16.mxu1 %v1798_v25 }
  0x4c   : > { %1666 = vmatmul.mubr.bf16.gmra.mxu0 %v1799_v26  ;;  %1718 = vmatmul.mubr.bf16.gmra.mxu1 %v1800_v27 }
  0x4d   : > { %1669 = vmatprep.mubr.bf16.mxu0 %v1801_v28  ;;  %1721 = vmatprep.mubr.bf16.mxu1 %v1802_v29 }
  0x54   : > { %1670 = vmatmul.mubr.bf16.gmra.mxu0 %v1803_v30  ;;  %1722 = vmatmul.mubr.bf16.gmra.mxu1 %v1804_v31 }
  0x55   : > { %1673 = vmatprep.mubr.bf16.mxu0 %v1805_v32  ;;  %1725 = vmatprep.mubr.bf16.mxu1 %v1806_v33 }
  0x5c   : > { %1674 = vmatmul.mubr.bf16.gmra.mxu0 %v1807_v34  ;;  %1726 = vmatmul.mubr.bf16.gmra.mxu1 %v1808_v35 }
  0x5d   : > { %1677 = vmatprep.mubr.bf16.mxu0 %v1809_v36  ;;  %1729 = vmatprep.mubr.bf16.mxu1 %v1810_v37 }
  0x64   : > { %1678 = vmatmul.mubr.bf16.gmra.mxu0 %v1811_v38  ;;  %1730 = vmatmul.mubr.bf16.gmra.mxu1 %v1812_v39 }
  0x65   : > { %1681 = vmatprep.mubr.bf16.mxu0 %v1813_v40  ;;  %1733 = vmatprep.mubr.bf16.mxu1 %v1814_v41 }
  0x6c   : > { %1682 = vmatmul.mubr.bf16.gmra.mxu0 %v1815_v42  ;;  %1734 = vmatmul.mubr.bf16.gmra.mxu1 %v1816_v43 }
  0x6d   : > { %1685 = vmatprep.mubr.bf16.mxu0 %v1817_v44  ;;  %1737 = vmatprep.mubr.bf16.mxu1 %v1818_v45 }
  0x74   : > { %1686 = vmatmul.mubr.bf16.gmra.mxu0 %v1819_v46  ;;  %1738 = vmatmul.mubr.bf16.gmra.mxu1 %v1820_v47 }
  0x75   : > { %1689 = vmatprep.mubr.bf16.mxu0 %v1821_v48  ;;  %1741 = vmatprep.mubr.bf16.mxu1 %v1822_v49 }
  0x7c   : > { %1690 = vmatmul.mubr.bf16.gmra.mxu0 %v1823_v50  ;;  %1742 = vmatmul.mubr.bf16.gmra.mxu1 %v1824_v51 }
  0x7d   : > { %1693 = vmatprep.mubr.bf16.mxu0 %v1825_v52  ;;  %1745 = vmatprep.mubr.bf16.mxu1 %v1826_v53 }
  0x84   : > { %1694 = vmatmul.mubr.bf16.gmra.mxu0 %v1827_v54  ;;  %1746 = vmatmul.mubr.bf16.gmra.mxu1 %v1828_v55  ;;  %v2054_v55 = vld [vmem:[%s2153_s2] ss:$0 sm:$0xff] }
  0x85   : > { %1697 = vmatprep.mubr.bf16.mxu0 %v1829_v56 }
  0x8c   : > { %1698 = vmatmul.mubr.bf16.gmra.mxu0 %v1830_v57 }
  0xec   : > { %v1948_v58 = vpop.f32.mrf.mxu0  ;;  %v1950_v59 = vpop.f32.mrf.mxu1 }
  0xee   : > { %v1952_v60 = vpop.f32.mrf.mxu0  ;;  %v881_v61 = vpop.f32.mrf.mxu1 }
  0xf0   : > { %v1954_v62 = vpop.f32.mrf.mxu0  ;;  %v1956_v63 = vpop.f32.mrf.mxu1 }
  0xf2   : > { %v1958_v0 = vpop.f32.mrf.mxu0  ;;  %v1960_v1 = vpop.f32.mrf.mxu1 }
  0xf3   : > { %2155 = vst [vmem:[#allocation2_spill] sm:$0xff] %v1958_v0 }
  0xf4   : > { %v1962_v2 = vpop.f32.mrf.mxu0  ;;  %v1964_v3 = vpop.f32.mrf.mxu1 }
  0xf6   : > { %v1966_v4 = vpop.f32.mrf.mxu0  ;;  %v1968_v5 = vpop.f32.mrf.mxu1 }
  0xf8   : > { %v1970_v6 = vpop.f32.mrf.mxu0  ;;  %v1972_v7 = vpop.f32.mrf.mxu1 }
  0xfa   : > { %v692_v8 = vpop.f32.mrf.mxu0  ;;  %v1974_v9 = vpop.f32.mrf.mxu1 }
  0xfc   : > { %v1976_v10 = vpop.f32.mrf.mxu0  ;;  %v1978_v11 = vpop.f32.mrf.mxu1 }
  0xfe   : > { %v1980_v12 = vpop.f32.mrf.mxu0  ;;  %v1982_v13 = vpop.f32.mrf.mxu1 }
 0x100   : > { %v1984_v14 = vpop.f32.mrf.mxu0  ;;  %v1986_v15 = vpop.f32.mrf.mxu1 }
 0x102   : > { %v1988_v16 = vpop.f32.mrf.mxu0  ;;  %v1990_v17 = vpop.f32.mrf.mxu1 }
 0x104   : > { %v1992_v18 = vpop.f32.mrf.mxu0  ;;  %v1994_v19 = vpop.f32.mrf.mxu1 }
 0x106   : > { %v1996_v20 = vpop.f32.mrf.mxu0  ;;  %v1998_v21 = vpop.f32.mrf.mxu1 }
 0x108   : > { %v2000_v22 = vpop.f32.mrf.mxu0  ;;  %v2002_v23 = vpop.f32.mrf.mxu1 }
 0x10a   : > { %v2004_v24 = vpop.f32.mrf.mxu0  ;;  %v2006_v25 = vpop.f32.mrf.mxu1 }
 0x10c   : > { %v2008_v26 = vpop.f32.mrf.mxu0  ;;  %v2010_v27 = vpop.f32.mrf.mxu1 }
 0x10e   : > { %v2012_v28 = vpop.f32.mrf.mxu0  ;;  %v2014_v29 = vpop.f32.mrf.mxu1 }
 0x110   : > { %v2016_v30 = vpop.f32.mrf.mxu0  ;;  %v2018_v31 = vpop.f32.mrf.mxu1 }
 0x112   : > { %v2020_v32 = vpop.f32.mrf.mxu0  ;;  %v2022_v33 = vpop.f32.mrf.mxu1 }
 0x114   : > { %v2024_v34 = vpop.f32.mrf.mxu0  ;;  %v2026_v35 = vpop.f32.mrf.mxu1 }
 0x115   : > { %2156 = vst [vmem:[#allocation3_spill] sm:$0xff] %v2026_v35 }
 0x116   : > { %v2028_v36 = vpop.f32.mrf.mxu0  ;;  %v2030_v37 = vpop.f32.mrf.mxu1 }
 0x118   : > { %v2032_v38 = vpop.f32.mrf.mxu0  ;;  %v2034_v39 = vpop.f32.mrf.mxu1 }
 0x119   : > { %2157 = vst [vmem:[#allocation4_spill] sm:$0xff] %v2032_v38 }
 0x11a   : > { %v2036_v40 = vpop.f32.mrf.mxu0  ;;  %v2038_v41 = vpop.f32.mrf.mxu1 }
 0x11b   : > { %2158 = vst [vmem:[#allocation5_spill] sm:$0xff] %v2038_v41 }
 0x11c   : > { %v2040_v42 = vpop.f32.mrf.mxu0  ;;  %v1727_v43 = vpop.f32.mrf.mxu1 }
 0x11d   : > { %2159 = vst [vmem:[#allocation6_spill] sm:$0xff] %v2040_v42 }
 0x11e   : > { %v2042_v44 = vpop.f32.mrf.mxu0  ;;  %v2044_v45 = vpop.f32.mrf.mxu1 }
 0x11f   : > { %2160 = vst [vmem:[#allocation7_spill] sm:$0xff] %v2042_v44  ;;  %2161 = vst [vmem:[#allocation8_spill] sm:$0xff] %v2044_v45  ;;  %v1100_v44 = vmax.f32 %v1960_v1, %v1727_v43 }
 0x120   : > { %v1676_v46 = vpop.f32.mrf.mxu0  ;;  %v1728_v47 = vpop.f32.mrf.mxu1 }
 0x121   : > { %v1074_v50 = vmax.f32 %v1948_v58, %v1676_v46  ;;  %v1101_v0 = vmax.f32 %v1950_v59, %v1728_v47 }
 0x122   : > { %v2048_v48 = vpop.f32.mrf.mxu0  ;;  %v980_v49 = vpop.f32.mrf.mxu1 }
 0x123   : > { %v1099_v51 = vmax.f32 %v881_v61, %v980_v49 }
 0x124   : > { %v1679_v52 = vpop.f32.mrf.mxu0  ;;  %v1731_v53 = vpop.f32.mrf.mxu1 }
 0x125   : > { %v1124_v54 = vmax.f32 %v1074_v50, %v1099_v51  ;;  %v1077_v35 = vmax.f32 %v692_v8, %v1679_v52 }
 0x126   : > { %v785_v56 = vpop.f32.mrf.mxu0  ;;  %v993_v57 = vpop.f32.mrf.mxu1 }
 0x127   : > { %v1075_v45 = vmax.f32 %v1954_v62, %v785_v56  ;;  %v1102_v58 = vmax.f32 %v1956_v63, %v993_v57  ;;  %v1156_v61 = vadd.f32 %v2054_v55, %v1124_v54 }
 0x128   : > { %v1680_v46 = vpop.f32.mrf.mxu0  ;;  %v1732_v49 = vpop.f32.mrf.mxu1 }
 0x129   : > { %v1125_v50 = vmax.f32 %v1075_v45, %v1100_v44  ;;  %v1127_v51 = vmax.f32 %v1077_v35, %v1102_v58  ;;  %v1078_v1 = vmax.f32 %v1962_v2, %v1680_v46  ;;  %v1181_v63 = vmax.f32 %v1156_v61, 0.0 }
 0x12a   : > { %v788_v42 = vpop.f32.mrf.mxu0  ;;  %v996_v38 = vpop.f32.mrf.mxu1 }
 0x12b   : > { %v1157_v41 = vadd.f32 %v2054_v55, %v1125_v50  ;;  %v1076_v8 = vmax.f32 %v1966_v4, %v788_v42  ;;  %v1103_v62 = vmax.f32 %v1968_v5, %v996_v38  ;;  %v1159_v44 = vadd.f32 %v2054_v55, %v1127_v51 }
 0x12c   : > { %v1683_v43 = vpop.f32.mrf.mxu0  ;;  %v1735_v52 = vpop.f32.mrf.mxu1  ;;  %v1104_v4 = vmax.f32 %v1974_v9, %v1731_v53  ;;  %v1105_v9 = vmax.f32 %v1964_v3, %v1732_v49 }
 0x12d   : > { %v1182_v54 = vmax.f32 %v1157_v41, 0.0  ;;  %v1126_v35 = vmax.f32 %v1076_v8, %v1101_v0  ;;  %v1128_v45 = vmax.f32 %v1078_v1, %v1103_v62  ;;  %v1081_v0 = vmax.f32 %v1988_v16, %v1683_v43 }
 0x12e   : > { %v801_v59 = vpop.f32.mrf.mxu0  ;;  %v1009_v2 = vpop.f32.mrf.mxu1  ;;  %v1184_v58 = vmax.f32 %v1159_v44, 0.0 }
 0x12f   : > { %v1512_v42 = vpack.c.bf16 %v1182_v54, %v1181_v63  ;;  %v1158_v5 = vadd.f32 %v2054_v55, %v1126_v35  ;;  %v1079_v38 = vmax.f32 %v1970_v6, %v801_v59  ;;  %v1160_v41 = vadd.f32 %v2054_v55, %v1128_v45 }
 0x130   : > { %v1106_v47 = vmax.f32 %v1972_v7, %v1009_v2  ;;  %v1684_v56 = vpop.f32.mrf.mxu0  ;;  %v1736_v57 = vpop.f32.mrf.mxu1  ;;  %v1108_v45 = vmax.f32 %v1990_v17, %v1735_v52 }
 0x131   : > { %1564 = vst [vmem:[%s2069_s15 + $0x8] sm:$0xff] %v1512_v42   ;;  %v1183_v61 = vmax.f32 %v1158_v5, 0.0  ;;  %v1129_v46 = vmax.f32 %v1079_v38, %v1104_v4  ;;  %v1082_v50 = vmax.f32 %v1976_v10, %v1684_v56  ;;  %v1185_v62 = vmax.f32 %v1160_v41, 0.0 }
 0x132   : > { %v1131_v53 = vmax.f32 %v1081_v0, %v1106_v47  ;;  %v804_v51 = vpop.f32.mrf.mxu0  ;;  %v1012_v6 = vpop.f32.mrf.mxu1  ;;  %v1109_v17 = vmax.f32 %v1978_v11, %v1736_v57 }
 0x133   : > { %v1517_v1 = vpack.c.bf16 %v1184_v58, %v1183_v61  ;;  %v1161_v8 = vadd.f32 %v2054_v55, %v1129_v46  ;;  %v1080_v16 = vmax.f32 %v1980_v12, %v804_v51  ;;  %v1107_v7 = vmax.f32 %v1982_v13, %v1012_v6 }
 0x134   : > { %v1687_v63 = vpop.f32.mrf.mxu0  ;;  %v1739_v43 = vpop.f32.mrf.mxu1  ;;  %v1163_v3 = vadd.f32 %v2054_v55, %v1131_v53 }
 0x135   : > { %1565 = vst [vmem:[%s2069_s15 + $0x10] sm:$0xff] %v1517_v1   ;;  %v1186_v54 = vmax.f32 %v1161_v8, 0.0  ;;  %v1130_v49 = vmax.f32 %v1080_v16, %v1105_v9  ;;  %v1132_v44 = vmax.f32 %v1082_v50, %v1107_v7  ;;  %v1085_v4 = vmax.f32 %v2004_v24, %v1687_v63 }
 0x136   : > { %v817_v10 = vpop.f32.mrf.mxu0  ;;  %v1025_v35 = vpop.f32.mrf.mxu1  ;;  %v1188_v41 = vmax.f32 %v1163_v3, 0.0  ;;  %v1112_v8 = vmax.f32 %v2006_v25, %v1739_v43 }
 0x137   : > { %v1522_v59 = vpack.c.bf16 %v1186_v54, %v1185_v62  ;;  %v1162_v2 = vadd.f32 %v2054_v55, %v1130_v49  ;;  %v1083_v12 = vmax.f32 %v1984_v14, %v817_v10  ;;  %v1164_v13 = vadd.f32 %v2054_v55, %v1132_v44 }
 0x138   : > { %v1110_v42 = vmax.f32 %v1986_v15, %v1025_v35  ;;  %v1688_v5 = vpop.f32.mrf.mxu0  ;;  %v1740_v38 = vpop.f32.mrf.mxu1 }
 0x139   : > { %1566 = vst [vmem:[%s2069_s15 + $0x18] sm:$0xff] %v1522_v59   ;;  %v1187_v0 = vmax.f32 %v1162_v2, 0.0  ;;  %v1133_v47 = vmax.f32 %v1083_v12, %v1108_v45  ;;  %v1086_v56 = vmax.f32 %v1992_v18, %v1688_v5  ;;  %v1189_v9 = vmax.f32 %v1164_v13, 0.0 }
 0x13a   : > { %v1135_v52 = vmax.f32 %v1085_v4, %v1110_v42  ;;  %v820_v58 = vpop.f32.mrf.mxu0  ;;  %v1028_v14 = vpop.f32.mrf.mxu1  ;;  %v1113_v25 = vmax.f32 %v1994_v19, %v1740_v38 }
 0x13b   : > { %v1527_v61 = vpack.c.bf16 %v1188_v41, %v1187_v0  ;;  %v1165_v46 = vadd.f32 %v2054_v55, %v1133_v47  ;;  %v1084_v24 = vmax.f32 %v1996_v20, %v820_v58  ;;  %v1111_v15 = vmax.f32 %v1998_v21, %v1028_v14 }
 0x13c   : > { %v1691_v53 = vpop.f32.mrf.mxu0  ;;  %v1743_v50 = vpop.f32.mrf.mxu1  ;;  %v1167_v11 = vadd.f32 %v2054_v55, %v1135_v52 }
 0x13d   : > { %1567 = vst [vmem:[%s2069_s15 + $0x20] sm:$0xff] %v1527_v61   ;;  %v1190_v51 = vmax.f32 %v1165_v46, 0.0  ;;  %v1134_v57 = vmax.f32 %v1084_v24, %v1109_v17  ;;  %v1136_v6 = vmax.f32 %v1086_v56, %v1111_v15  ;;  %v1089_v62 = vmax.f32 %v2020_v32, %v1691_v53 }
 0x13e   : > { %v833_v18 = vpop.f32.mrf.mxu0  ;;  %v1041_v1 = vpop.f32.mrf.mxu1  ;;  %v1192_v49 = vmax.f32 %v1167_v11, 0.0  ;;  %v1116_v0 = vmax.f32 %v2022_v33, %v1743_v50 }
 0x13f   : > { %v1532_v16 = vpack.c.bf16 %v1190_v51, %v1189_v9  ;;  %v1166_v7 = vadd.f32 %v2054_v55, %v1134_v57  ;;  %v1087_v20 = vmax.f32 %v2000_v22, %v833_v18  ;;  %v1168_v21 = vadd.f32 %v2054_v55, %v1136_v6 }
 0x140   : > { %v1114_v63 = vmax.f32 %v2002_v23, %v1041_v1  ;;  %v1692_v54 = vpop.f32.mrf.mxu0  ;;  %v1744_v3 = vpop.f32.mrf.mxu1 }
 0x141   : > { %1568 = vst [vmem:[%s2069_s15 + $0x28] sm:$0xff] %v1532_v16   ;;  %v1191_v44 = vmax.f32 %v1166_v7, 0.0  ;;  %v1137_v10 = vmax.f32 %v1087_v20, %v1112_v8  ;;  %v1090_v35 = vmax.f32 %v2008_v26, %v1692_v54  ;;  %v1193_v12 = vmax.f32 %v1168_v21, 0.0  ;;  %v2162_v21 = vld [vmem:[#allocation5_spill] sm:$0xff]  ;;  %v2165_v54 = vld [vmem:[#allocation2_spill] sm:$0xff] }
 0x142   : > { %v1139_v43 = vmax.f32 %v1089_v62, %v1114_v63  ;;  %v836_v45 = vpop.f32.mrf.mxu0  ;;  %v1044_v22 = vpop.f32.mrf.mxu1  ;;  %v1117_v33 = vmax.f32 %v2010_v27, %v1744_v3  ;;  %v2164_v63 = vld [vmem:[#allocation6_spill] sm:$0xff] }
 0x143   : > { %v1537_v59 = vpack.c.bf16 %v1192_v49, %v1191_v44  ;;  %v1169_v2 = vadd.f32 %v2054_v55, %v1137_v10  ;;  %v1088_v32 = vmax.f32 %v2012_v28, %v836_v45  ;;  %v1115_v23 = vmax.f32 %v2014_v29, %v1044_v22  ;;  %v2166_v10 = vld [vmem:[#allocation8_spill] sm:$0xff] }
 0x144   : > { %v1695_v13 = vpop.f32.mrf.mxu0  ;;  %v1747_v4 = vpop.f32.mrf.mxu1  ;;  %v1171_v19 = vadd.f32 %v2054_v55, %v1139_v43  ;;  %v1073_v3 = vmax.f32 %v2165_v54, %v2164_v63 }
 0x145   : > { %1569 = vst [vmem:[%s2069_s15 + $0x30] sm:$0xff] %v1537_v59   ;;  %v1194_v42 = vmax.f32 %v1169_v2, 0.0  ;;  %v1138_v5 = vmax.f32 %v1088_v32, %v1113_v25  ;;  %v1140_v38 = vmax.f32 %v1090_v35, %v1115_v23  ;;  %v1093_v52 = vmax.f32 %v2036_v40, %v1695_v13  ;;  %v2167_v25 = vld [vmem:[#allocation3_spill] sm:$0xff] }
 0x146   : > { %v849_v26 = vpop.f32.mrf.mxu0  ;;  %v1057_v41 = vpop.f32.mrf.mxu1  ;;  %v1196_v61 = vmax.f32 %v1171_v19, 0.0  ;;  %v2168_v23 = vld [vmem:[#allocation7_spill] sm:$0xff] }
 0x147   : > { %v1542_v47 = vpack.c.bf16 %v1194_v42, %v1193_v12  ;;  %v1170_v17 = vadd.f32 %v2054_v55, %v1138_v5  ;;  %v1091_v28 = vmax.f32 %v2016_v30, %v849_v26  ;;  %v1172_v29 = vadd.f32 %v2054_v55, %v1140_v38 }
 0x148   : > { %v1118_v56 = vmax.f32 %v2018_v31, %v1057_v41  ;;  %v1696_v58 = vpop.f32.mrf.mxu0  ;;  %v1748_v14 = vpop.f32.mrf.mxu1  ;;  %v1072_v31 = vmax.f32 %v1952_v60, %v2048_v48  ;;  %v1120_v60 = vmax.f32 %v2162_v21, %v1747_v4  ;;  %v2163_v48 = vld [vmem:[#allocation4_spill] sm:$0xff] }
 0x149   : > { %1570 = vst [vmem:[%s2069_s15 + $0x38] sm:$0xff] %v1542_v47   ;;  %v1195_v46 = vmax.f32 %v1170_v17, 0.0  ;;  %v1141_v24 = vmax.f32 %v1091_v28, %v1116_v0  ;;  %v1197_v11 = vmax.f32 %v1172_v29, 0.0  ;;  %v1094_v57 = vmax.f32 %v2024_v34, %v1696_v58 }
 0x14a   : > { %v1143_v15 = vmax.f32 %v1093_v52, %v1118_v56  ;;  %v852_v9 = vpop.f32.mrf.mxu0  ;;  %v1060_v53 = vpop.f32.mrf.mxu1  ;;  %v1121_v43 = vmax.f32 %v2167_v25, %v1748_v14 }
 0x14b   : > { %v1547_v50 = vpack.c.bf16 %v1196_v61, %v1195_v46  ;;  %v1173_v30 = vadd.f32 %v2054_v55, %v1141_v24  ;;  %v1092_v51 = vmax.f32 %v2028_v36, %v852_v9  ;;  %v1119_v40 = vmax.f32 %v2030_v37, %v1060_v53 }
 0x14c   : > { %v1699_v6 = vpop.f32.mrf.mxu0  ;;  %v1175_v18 = vadd.f32 %v2054_v55, %v1143_v15 }
 0x14d   : > { %1571 = vst [vmem:[%s2069_s15 + $0x40] sm:$0xff] %v1547_v50   ;;  %v1198_v27 = vmax.f32 %v1173_v30, 0.0  ;;  %v1142_v1 = vmax.f32 %v1092_v51, %v1117_v33  ;;  %v1097_v8 = vmax.f32 %v1699_v6, %v2034_v39  ;;  %v1144_v16 = vmax.f32 %v1094_v57, %v1119_v40 }
 0x14e   : > { %v865_v7 = vpop.f32.mrf.mxu0  ;;  %v1200_v49 = vmax.f32 %v1175_v18, 0.0 }
 0x14f   : > { %v1552_v36 = vpack.c.bf16 %v1198_v27, %v1197_v11  ;;  %v1174_v37 = vadd.f32 %v2054_v55, %v1142_v1  ;;  %v1122_v20 = vmax.f32 %v1072_v31, %v1097_v8  ;;  %v1095_v62 = vmax.f32 %v2163_v48, %v865_v7 }
 0x150   : > { %v1700_v34 = vpop.f32.mrf.mxu0  ;;  %v1176_v35 = vadd.f32 %v2054_v55, %v1144_v16 }
 0x151   : > { %1572 = vst [vmem:[%s2069_s15 + $0x48] sm:$0xff] %v1552_v36   ;;  %v1199_v44 = vmax.f32 %v1174_v37, 0.0  ;;  %v1098_v39 = vmax.f32 %v1700_v34, %v2166_v10  ;;  %v1145_v45 = vmax.f32 %v1095_v62, %v1120_v60  ;;  %v1154_v2 = vadd.f32 %v2054_v55, %v1122_v20 }
 0x152   : > { %v868_v22 = vpop.f32.mrf.mxu0  ;;  %v1201_v19 = vmax.f32 %v1176_v35, 0.0 }
 0x153   : > { %v1557_v59 = vpack.c.bf16 %v1200_v49, %v1199_v44  ;;  %v1123_v32 = vmax.f32 %v1073_v3, %v1098_v39  ;;  %v1096_v12 = vmax.f32 %v2168_v23, %v868_v22  ;;  %v1177_v13 = vadd.f32 %v2054_v55, %v1145_v45 }
 0x154   : > { %v1179_v38 = vmax.f32 %v1154_v2, 0.0 }
 0x155   : > { %1573 = vst [vmem:[%s2069_s15 + $0x50] sm:$0xff] %v1557_v59   ;;  %v1155_v4 = vadd.f32 %v2054_v55, %v1123_v32  ;;  %v1146_v42 = vmax.f32 %v1096_v12, %v1121_v43  ;;  %v1202_v5 = vmax.f32 %v1177_v13, 0.0 }
 0x157   : > { %v1180_v26 = vmax.f32 %v1155_v4, 0.0  ;;  %v1178_v41 = vadd.f32 %v2054_v55, %v1146_v42  ;;  %v1562_v0 = vpack.c.bf16 %v1202_v5, %v1201_v19 }
 0x159   : > { %v1507_v47 = vpack.c.bf16 %v1180_v26, %v1179_v38  ;;  %v1203_v17 = vmax.f32 %v1178_v41, 0.0  ;;  %1574 = vst [vmem:[%s2069_s15 + $0x58] sm:$0xff] %v1562_v0  }
 0x15b   : > { %1508 = vst [vmem:[%s2069_s15] sm:$0xff] %v1507_v47   ;;  %v1503_v28 = vpack.c.bf16 %v1203_v17, %v1203_v17 }
 0x15d   : > { %1329 = vst [vmem:[%s2069_s15 + $0x60] sm:$0xf] %v1503_v28 }
 0x15e PF: > { %s13_s12 = sadd.s32 1, %s1837_s12  }
 0x15f   : > { %p10_p5 = scmp.ge.s32.totalorder %s13_s12, 4  }
 0x161   :  { %12 = sbr.rel (!%p10_p5) target bundleno = 1 (0x1), region = 62 }

// kernel: net_forward.4
= control target key start
LH: loop header
LB: loop body
LE: loop exit
PB: predicated region body
PF: predicated region fallthrough
CT: control target
= control target key end

     0   :  { %s1000_s1 = inlined_call_operand.vmem [shape: bf16[256,128], index: 1, kind: input, shape index: {}]   ;;  %s1001_s0 = inlined_call_operand.vmem [shape: bf16[224,256], index: 0, kind: input, shape index: {}]   ;;  %s1002_s2 = inlined_call_operand.vmem [shape: f32[1,128], index: 2, kind: input, shape index: {}]   ;;  %s1003_s3 = inlined_call_operand.vmem [shape: bf16[56,128], index: 3, kind: output, shape index: {}]  }
   0x1   :  { %v730_v0 = vld [vmem:[%s1000_s1 + $0x78] sm:$0xff]   ;;  %v732_v2 = vld [vmem:[%s1000_s1 + $0x70] sm:$0xff]   ;;  %v734_v4 = vld [vmem:[%s1000_s1 + $0x68] sm:$0xff]  }
   0x2   :  { %v731_v1 = vld [vmem:[%s1000_s1 + $0x38] sm:$0xff]   ;;  %614 = vmatprep.subr.bf16.mxu0 %v730_v0  ;;  %714 = vmatprep.subr.bf16.mxu1 %v730_v0  ;;  %v733_v3 = vld [vmem:[%s1000_s1 + $0x30] sm:$0xff]   ;;  %v735_v5 = vld [vmem:[%s1000_s1 + $0x28] sm:$0xff]  }
   0x3   :  { %615 = vmatpush3.bf16.msra.mxu0 %v731_v1  ;;  %722 = vmatpush3.bf16.msra.mxu1 %v731_v1  ;;  %v736_v6 = vld [vmem:[%s1000_s1 + $0x60] sm:$0xff]   ;;  %v738_v8 = vld [vmem:[%s1000_s1 + $0x58] sm:$0xff]   ;;  %v740_v10 = vld [vmem:[%s1000_s1 + $0x50] sm:$0xff]  }
   0x4   :  { %616 = vmatprep.subr.bf16.mxu0 %v732_v2  ;;  %715 = vmatprep.subr.bf16.mxu1 %v732_v2  ;;  %v737_v7 = vld [vmem:[%s1000_s1 + $0x20] sm:$0xff]   ;;  %v739_v9 = vld [vmem:[%s1000_s1 + $0x18] sm:$0xff]   ;;  %v741_v13 = vld [vmem:[%s1000_s1 + $0x10] sm:$0xff]  }
   0x5   :  { %v748_v11 = vld [vmem:[%s1001_s0 + $0x4] ss:$8 sps:$4 sm:$0xff]   ;;  %v751_v12 = vld [vmem:[%s1001_s0 + $0x74] ss:$8 sps:$4 sm:$0xff]   ;;  %v746_v18 = vld [vmem:[%s1001_s0] ss:$8 sps:$4 sm:$0xff]  }
   0x6   :  { %v742_v14 = vld [vmem:[%s1000_s1 + $0x48] sm:$0xff]   ;;  %343 = vmatprep.mubr.bf16.mxu0 %v748_v11  ;;  %399 = vmatprep.mubr.bf16.mxu1 %v751_v12  ;;  %v744_v16 = vld [vmem:[%s1000_s1 + $0x40] sm:$0xff]   ;;  %v749_v19 = vld [vmem:[%s1001_s0 + $0x70] ss:$8 sps:$4 sm:$0xff]  }
   0x7   :  { %617 = vmatpush3.bf16.msra.mxu0 %v733_v3  ;;  %723 = vmatpush3.bf16.msra.mxu1 %v733_v3  ;;  %v743_v15 = vld [vmem:[%s1000_s1 + $0x8] sm:$0xff]   ;;  %v745_v17 = vld [vmem:[%s1000_s1] sm:$0xff]   ;;  %v752_v20 = vld [vmem:[%s1001_s0 + $0x14] ss:$8 sps:$4 sm:$0xff]  }
   0x8   :  { %618 = vmatprep.subr.bf16.mxu0 %v734_v4  ;;  %716 = vmatprep.subr.bf16.mxu1 %v734_v4  ;;  %v754_v21 = vld [vmem:[%s1001_s0 + $0x84] ss:$8 sps:$4 sm:$0xff]   ;;  %v756_v22 = vld [vmem:[%s1001_s0 + $0x10] ss:$8 sps:$4 sm:$0xff]   ;;  %v757_v23 = vld [vmem:[%s1001_s0 + $0x80] ss:$8 sps:$4 sm:$0xff]  }
   0x9   :  { %v758_v24 = vld [vmem:[%s1001_s0 + $0x24] ss:$8 sps:$4 sm:$0xff]   ;;  %v760_v25 = vld [vmem:[%s1001_s0 + $0x94] ss:$8 sps:$4 sm:$0xff]   ;;  %v762_v26 = vld [vmem:[%s1001_s0 + $0x20] ss:$8 sps:$4 sm:$0xff]  }
   0xa   :  { %v763_v27 = vld [vmem:[%s1001_s0 + $0x90] ss:$8 sps:$4 sm:$0xff]   ;;  %v764_v28 = vld [vmem:[%s1001_s0 + $0x34] ss:$8 sps:$4 sm:$0xff]   ;;  %v766_v29 = vld [vmem:[%s1001_s0 + $0xa4] ss:$8 sps:$4 sm:$0xff]  }
   0xb   :  { %619 = vmatpush3.bf16.msra.mxu0 %v735_v5  ;;  %724 = vmatpush3.bf16.msra.mxu1 %v735_v5  ;;  %v768_v30 = vld [vmem:[%s1001_s0 + $0x30] ss:$8 sps:$4 sm:$0xff]   ;;  %v769_v31 = vld [vmem:[%s1001_s0 + $0xa0] ss:$8 sps:$4 sm:$0xff]   ;;  %v770_v32 = vld [vmem:[%s1001_s0 + $0x44] ss:$8 sps:$4 sm:$0xff]  }
   0xc   :  { %620 = vmatprep.subr.bf16.mxu0 %v736_v6  ;;  %717 = vmatprep.subr.bf16.mxu1 %v736_v6  ;;  %v772_v33 = vld [vmem:[%s1001_s0 + $0xb4] ss:$8 sps:$4 sm:$0xff]   ;;  %v774_v34 = vld [vmem:[%s1001_s0 + $0x40] ss:$8 sps:$4 sm:$0xff]   ;;  %v775_v35 = vld [vmem:[%s1001_s0 + $0xb0] ss:$8 sps:$4 sm:$0xff]  }
   0xd   :  { %v776_v36 = vld [vmem:[%s1001_s0 + $0x54] ss:$8 sps:$4 sm:$0xff]   ;;  %v778_v37 = vld [vmem:[%s1001_s0 + $0xc4] ss:$8 sps:$4 sm:$0xff]   ;;  %v780_v38 = vld [vmem:[%s1001_s0 + $0x50] ss:$8 sps:$4 sm:$0xff]  }
   0xe   :  { %v781_v39 = vld [vmem:[%s1001_s0 + $0xc0] ss:$8 sps:$4 sm:$0xff]   ;;  %v782_v40 = vld [vmem:[%s1001_s0 + $0x64] ss:$8 sps:$4 sm:$0xff]   ;;  %v784_v41 = vld [vmem:[%s1001_s0 + $0xd4] ss:$8 sps:$4 sm:$0xff]  }
   0xf   :  { %621 = vmatpush3.bf16.msra.mxu0 %v737_v7  ;;  %725 = vmatpush3.bf16.msra.mxu1 %v737_v7  ;;  %v786_v42 = vld [vmem:[%s1001_s0 + $0x60] ss:$8 sps:$4 sm:$0xff]   ;;  %v787_v43 = vld [vmem:[%s1001_s0 + $0xd0] ss:$8 sps:$4 sm:$0xff]  }
  0x10   :  { %622 = vmatprep.subr.bf16.mxu0 %v738_v8  ;;  %718 = vmatprep.subr.bf16.mxu1 %v738_v8 }
  0x13   :  { %623 = vmatpush3.bf16.msra.mxu0 %v739_v9  ;;  %726 = vmatpush3.bf16.msra.mxu1 %v739_v9 }
  0x14   :  { %624 = vmatprep.subr.bf16.mxu0 %v740_v10  ;;  %719 = vmatprep.subr.bf16.mxu1 %v740_v10 }
  0x17   :  { %625 = vmatpush3.bf16.msra.mxu0 %v741_v13  ;;  %727 = vmatpush3.bf16.msra.mxu1 %v741_v13 }
  0x18   :  { %626 = vmatprep.subr.bf16.mxu0 %v742_v14  ;;  %720 = vmatprep.subr.bf16.mxu1 %v742_v14 }
  0x1b   :  { %627 = vmatpush3.bf16.msra.mxu0 %v743_v15  ;;  %728 = vmatpush3.bf16.msra.mxu1 %v743_v15 }
  0x1c   :  { %628 = vmatprep.subr.bf16.mxu0 %v744_v16  ;;  %721 = vmatprep.subr.bf16.mxu1 %v744_v16 }
  0x1f   :  { %629 = vmatpush3.bf16.msra.mxu0 %v745_v17  ;;  %729 = vmatpush3.bf16.msra.mxu1 %v745_v17 }
  0x22   :  { %344 = vmatmul.mubr.bf16.vlgmr.msra.gmra.mxu0 %v746_v18  ;;  %400 = vmatmul.mubr.bf16.vlgmr.msra.gmra.mxu1 %v749_v19 }
  0x23   :  { %351 = vmatprep.mubr.bf16.mxu0 %v752_v20  ;;  %407 = vmatprep.mubr.bf16.mxu1 %v754_v21 }
  0x2a   :  { %352 = vmatmul.mubr.bf16.gmra.mxu0 %v756_v22  ;;  %408 = vmatmul.mubr.bf16.gmra.mxu1 %v757_v23 }
  0x2b   :  { %359 = vmatprep.mubr.bf16.mxu0 %v758_v24  ;;  %415 = vmatprep.mubr.bf16.mxu1 %v760_v25  ;;  %v967_v25 = vld [vmem:[%s1002_s2] ss:$0 sm:$0xff] }
  0x32   :  { %360 = vmatmul.mubr.bf16.gmra.mxu0 %v762_v26  ;;  %416 = vmatmul.mubr.bf16.gmra.mxu1 %v763_v27 }
  0x33   :  { %367 = vmatprep.mubr.bf16.mxu0 %v764_v28  ;;  %423 = vmatprep.mubr.bf16.mxu1 %v766_v29 }
  0x3a   :  { %368 = vmatmul.mubr.bf16.gmra.mxu0 %v768_v30  ;;  %424 = vmatmul.mubr.bf16.gmra.mxu1 %v769_v31 }
  0x3b   :  { %375 = vmatprep.mubr.bf16.mxu0 %v770_v32  ;;  %431 = vmatprep.mubr.bf16.mxu1 %v772_v33 }
  0x42   :  { %376 = vmatmul.mubr.bf16.gmra.mxu0 %v774_v34  ;;  %432 = vmatmul.mubr.bf16.gmra.mxu1 %v775_v35 }
  0x43   :  { %383 = vmatprep.mubr.bf16.mxu0 %v776_v36  ;;  %439 = vmatprep.mubr.bf16.mxu1 %v778_v37 }
  0x4a   :  { %384 = vmatmul.mubr.bf16.gmra.mxu0 %v780_v38  ;;  %440 = vmatmul.mubr.bf16.gmra.mxu1 %v781_v39 }
  0x4b   :  { %391 = vmatprep.mubr.bf16.mxu0 %v782_v40  ;;  %447 = vmatprep.mubr.bf16.mxu1 %v784_v41 }
  0x52   :  { %392 = vmatmul.mubr.bf16.gmra.mxu0 %v786_v42  ;;  %448 = vmatmul.mubr.bf16.gmra.mxu1 %v787_v43 }
  0xe2   :  { %v630_v44 = vpop.f32.mrf.mxu0  ;;  %v672_v45 = vpop.f32.mrf.mxu1 }
  0xe4   :  { %v631_v46 = vpop.f32.mrf.mxu0  ;;  %v673_v47 = vpop.f32.mrf.mxu1 }
  0xe5   :  { %v632_v12 = vadd.f32 %v631_v46, %v630_v44  ;;  %v674_v13 = vadd.f32 %v673_v47, %v672_v45 }
  0xe6   :  { %v633_v48 = vpop.f32.mrf.mxu0  ;;  %v675_v49 = vpop.f32.mrf.mxu1 }
  0xe8   :  { %v634_v50 = vpop.f32.mrf.mxu0  ;;  %v676_v51 = vpop.f32.mrf.mxu1 }
  0xe9   :  { %v635_v20 = vadd.f32 %v634_v50, %v633_v48  ;;  %v677_v23 = vadd.f32 %v676_v51, %v675_v49 }
  0xea   :  { %v636_v52 = vpop.f32.mrf.mxu0  ;;  %v678_v53 = vpop.f32.mrf.mxu1 }
  0xec   :  { %v637_v54 = vpop.f32.mrf.mxu0  ;;  %v679_v55 = vpop.f32.mrf.mxu1 }
  0xed   :  { %v638_v32 = vadd.f32 %v637_v54, %v636_v52  ;;  %v680_v36 = vadd.f32 %v679_v55, %v678_v53 }
  0xee   :  { %v639_v56 = vpop.f32.mrf.mxu0  ;;  %v681_v57 = vpop.f32.mrf.mxu1 }
  0xf0   :  { %v640_v58 = vpop.f32.mrf.mxu0  ;;  %v682_v59 = vpop.f32.mrf.mxu1 }
  0xf1   :  { %v641_v45 = vadd.f32 %v640_v58, %v639_v56  ;;  %v683_v46 = vadd.f32 %v682_v59, %v681_v57 }
  0xf2   :  { %v940_v60 = vpop.f32.mrf.mxu0  ;;  %v942_v61 = vpop.f32.mrf.mxu1 }
  0xf4   :  { %v944_v62 = vpop.f32.mrf.mxu0  ;;  %v946_v63 = vpop.f32.mrf.mxu1 }
  0xf5   :  { %v686_v57 = vadd.f32 %v946_v63, %v942_v61 }
  0xf6   :  { %v948_v0 = vpop.f32.mrf.mxu0  ;;  %v950_v1 = vpop.f32.mrf.mxu1 }
  0xf8   :  { %v952_v2 = vpop.f32.mrf.mxu0  ;;  %v954_v3 = vpop.f32.mrf.mxu1 }
  0xfa   :  { %v956_v4 = vpop.f32.mrf.mxu0  ;;  %v958_v5 = vpop.f32.mrf.mxu1 }
  0xfc   :  { %v960_v6 = vpop.f32.mrf.mxu0  ;;  %v962_v7 = vpop.f32.mrf.mxu1 }
  0xfe   :  { %v651_v8 = vpop.f32.mrf.mxu0  ;;  %v693_v9 = vpop.f32.mrf.mxu1 }
 0x100   :  { %v652_v10 = vpop.f32.mrf.mxu0  ;;  %v694_v11 = vpop.f32.mrf.mxu1 }
 0x101   :  { %v653_v14 = vadd.f32 %v652_v10, %v651_v8  ;;  %v695_v15 = vadd.f32 %v694_v11, %v693_v9  ;;  %v644_v11 = vadd.f32 %v944_v62, %v940_v60  ;;  %v647_v62 = vadd.f32 %v952_v2, %v948_v0 }
 0x102   :  { %v654_v16 = vpop.f32.mrf.mxu0  ;;  %v696_v17 = vpop.f32.mrf.mxu1  ;;  %v692_v0 = vadd.f32 %v962_v7, %v958_v5 }
 0x103   :  { %v456_v18 = vmax.f32 %v632_v12, %v653_v14  ;;  %v463_v19 = vmax.f32 %v674_v13, %v695_v15 }
 0x104   :  { %v655_v21 = vpop.f32.mrf.mxu0  ;;  %v697_v22 = vpop.f32.mrf.mxu1 }
 0x105   :  { %v470_v24 = vmax.f32 %v456_v18, %v463_v19  ;;  %v656_v26 = vadd.f32 %v655_v21, %v654_v16  ;;  %v698_v27 = vadd.f32 %v697_v22, %v696_v17  ;;  %v689_v19 = vadd.f32 %v954_v3, %v950_v1 }
 0x106   :  { %v657_v28 = vpop.f32.mrf.mxu0  ;;  %v699_v29 = vpop.f32.mrf.mxu1 }
 0x107   :  { %v457_v30 = vmax.f32 %v635_v20, %v656_v26  ;;  %v464_v31 = vmax.f32 %v677_v23, %v698_v27  ;;  %v484_v33 = vadd.f32 %v967_v25, %v470_v24 }
 0x108   :  { %v658_v34 = vpop.f32.mrf.mxu0  ;;  %v700_v35 = vpop.f32.mrf.mxu1 }
 0x109   :  { %v471_v37 = vmax.f32 %v457_v30, %v464_v31  ;;  %v659_v38 = vadd.f32 %v658_v34, %v657_v28  ;;  %v701_v39 = vadd.f32 %v700_v35, %v699_v29  ;;  %v491_v47 = vmax.f32 %v484_v33, 0.0 }
 0x10a   :  { %v660_v40 = vpop.f32.mrf.mxu0  ;;  %v702_v41 = vpop.f32.mrf.mxu1  ;;  %v650_v31 = vadd.f32 %v960_v6, %v956_v4 }
 0x10b   :  { %v485_v42 = vadd.f32 %v967_v25, %v471_v37  ;;  %v458_v43 = vmax.f32 %v638_v32, %v659_v38  ;;  %v465_v44 = vmax.f32 %v680_v36, %v701_v39 }
 0x10c   :  { %v661_v48 = vpop.f32.mrf.mxu0  ;;  %v703_v49 = vpop.f32.mrf.mxu1 }
 0x10d   :  { %v492_v50 = vmax.f32 %v485_v42, 0.0  ;;  %v472_v51 = vmax.f32 %v458_v43, %v465_v44  ;;  %v662_v52 = vadd.f32 %v661_v48, %v660_v40  ;;  %v704_v54 = vadd.f32 %v703_v49, %v702_v41 }
 0x10e   :  { %v663_v8 = vpop.f32.mrf.mxu0  ;;  %v705_v53 = vpop.f32.mrf.mxu1 }
 0x10f   :  { %v600_v55 = vpack.c.bf16 %v492_v50, %v491_v47  ;;  %v459_v9 = vmax.f32 %v641_v45, %v662_v52  ;;  %v466_v10 = vmax.f32 %v683_v46, %v704_v54  ;;  %v486_v12 = vadd.f32 %v967_v25, %v472_v51 }
 0x110   :  { %v664_v13 = vpop.f32.mrf.mxu0  ;;  %v706_v56 = vpop.f32.mrf.mxu1 }
 0x111   :  { %601 = vst [vmem:[%s1003_s3] sm:$0xff] %v600_v55   ;;  %v473_v58 = vmax.f32 %v459_v9, %v466_v10  ;;  %v665_v59 = vadd.f32 %v664_v13, %v663_v8  ;;  %v707_v14 = vadd.f32 %v706_v56, %v705_v53  ;;  %v493_v61 = vmax.f32 %v486_v12, 0.0 }
 0x112   :  { %v666_v15 = vpop.f32.mrf.mxu0  ;;  %v708_v16 = vpop.f32.mrf.mxu1 }
 0x113   :  { %v487_v17 = vadd.f32 %v967_v25, %v473_v58  ;;  %v460_v18 = vmax.f32 %v644_v11, %v665_v59  ;;  %v467_v60 = vmax.f32 %v686_v57, %v707_v14 }
 0x114   :  { %v667_v63 = vpop.f32.mrf.mxu0  ;;  %v709_v20 = vpop.f32.mrf.mxu1 }
 0x115   :  { %v494_v21 = vmax.f32 %v487_v17, 0.0  ;;  %v474_v22 = vmax.f32 %v460_v18, %v467_v60  ;;  %v668_v23 = vadd.f32 %v667_v63, %v666_v15  ;;  %v710_v24 = vadd.f32 %v709_v20, %v708_v16 }
 0x116   :  { %v669_v26 = vpop.f32.mrf.mxu0  ;;  %v711_v27 = vpop.f32.mrf.mxu1 }
 0x117   :  { %v605_v28 = vpack.c.bf16 %v494_v21, %v493_v61  ;;  %v461_v29 = vmax.f32 %v647_v62, %v668_v23  ;;  %v468_v30 = vmax.f32 %v689_v19, %v710_v24  ;;  %v488_v3 = vadd.f32 %v967_v25, %v474_v22 }
 0x118   :  { %v670_v2 = vpop.f32.mrf.mxu0  ;;  %v712_v1 = vpop.f32.mrf.mxu1 }
 0x119   :  { %612 = vst [vmem:[%s1003_s3 + $0x8] sm:$0xff] %v605_v28   ;;  %v475_v32 = vmax.f32 %v461_v29, %v468_v30  ;;  %v671_v33 = vadd.f32 %v670_v2, %v669_v26  ;;  %v713_v34 = vadd.f32 %v712_v1, %v711_v27  ;;  %v495_v38 = vmax.f32 %v488_v3, 0.0 }
 0x11b   :  { %v489_v35 = vadd.f32 %v967_v25, %v475_v32  ;;  %v462_v36 = vmax.f32 %v650_v31, %v671_v33  ;;  %v469_v37 = vmax.f32 %v692_v0, %v713_v34 }
 0x11d   :  { %v496_v4 = vmax.f32 %v489_v35, 0.0  ;;  %v476_v6 = vmax.f32 %v462_v36, %v469_v37 }
 0x11f   :  { %v610_v39 = vpack.c.bf16 %v496_v4, %v495_v38  ;;  %v490_v5 = vadd.f32 %v967_v25, %v476_v6 }
 0x121   :  { %613 = vst [vmem:[%s1003_s3 + $0x10] sm:$0xff] %v610_v39   ;;  %v497_v7 = vmax.f32 %v490_v5, 0.0 }
 0x123   :  { %v596_v40 = vpack.c.bf16 %v497_v7, %v497_v7 }
 0x125   :  { %533 = vst [vmem:[%s1003_s3 + $0x18] sm:$0xf] %v596_v40 }

// kernel: net_forward.5
= control target key start
LH: loop header
LB: loop body
LE: loop exit
PB: predicated region body
PF: predicated region fallthrough
CT: control target
= control target key end

     0   :  { %vm3325_vm0 = vmmov 0   ;;  %s4095_s1 = inlined_call_operand.vmem [shape: bf16[3200,128], index: 1, kind: input, shape index: {}]   ;;  %s4096_s0 = inlined_call_operand.vmem [shape: bf16[8,3200], index: 0, kind: input, shape index: {}]   ;;  %s4097_s2 = inlined_call_operand.vmem [shape: f32[1,128], index: 2, kind: input, shape index: {}]   ;;  %s4098_s3 = inlined_call_operand.vmem [shape: bf16[128,128], index: 3, kind: input, shape index: {}]   ;;  %s4099_s5 = inlined_call_operand.vmem [shape: bf16[128,128], index: 5, kind: input, shape index: {}]   ;;  %s4100_s4 = inlined_call_operand.vmem [shape: f32[1,128], index: 4, kind: input, shape index: {}]   ;;  %s4101_s6 = inlined_call_operand.vmem [shape: f32[1,128], index: 6, kind: input, shape index: {}]   ;;  %s4102_s7 = inlined_call_operand.vmem [shape: f32[8,128], index: 7, kind: output, shape index: {}]  }
   0x1   :  { %v3083_v0 = vld [vmem:[%s4095_s1 + $0x78] sm:$0xff]   ;;  %v3087_v4 = vld [vmem:[%s4095_s1 + $0x70] sm:$0xff]   ;;  %v3091_v8 = vld [vmem:[%s4095_s1 + $0x68] sm:$0xff]  }
   0x2   :  { %v3084_v1 = vld [vmem:[%s4095_s1 + $0x38] sm:$0xff]   ;;  %2730 = vmatprep.subr.bf16.mxu0 %v3083_v0  ;;  %v3088_v5 = vld [vmem:[%s4095_s1 + $0x30] sm:$0xff]   ;;  %v3092_v9 = vld [vmem:[%s4095_s1 + $0x28] sm:$0xff]  }
   0x3   :  { %v3085_v2 = vld [vmem:[%s4095_s1 + $0xf8] sm:$0xff]   ;;  %2731 = vmatpush3.bf16.msra.mxu0 %v3084_v1  ;;  %v3089_v6 = vld [vmem:[%s4095_s1 + $0xf0] sm:$0xff]   ;;  %v3093_v10 = vld [vmem:[%s4095_s1 + $0xe8] sm:$0xff]  }
   0x4   :  { %v3086_v3 = vld [vmem:[%s4095_s1 + $0xb8] sm:$0xff]   ;;  %2752 = vmatprep.subr.bf16.mxu1 %v3085_v2  ;;  %2732 = vmatprep.subr.bf16.mxu0 %v3087_v4  ;;  %v3090_v7 = vld [vmem:[%s4095_s1 + $0xb0] sm:$0xff]   ;;  %v3094_v11 = vld [vmem:[%s4095_s1 + $0xa8] sm:$0xff]  }
   0x5   :  { %2753 = vmatpush3.bf16.msra.mxu1 %v3086_v3  ;;  %v3095_v12 = vld [vmem:[%s4095_s1 + $0x60] sm:$0xff]   ;;  %v3099_v16 = vld [vmem:[%s4095_s1 + $0x58] sm:$0xff]   ;;  %v3103_v20 = vld [vmem:[%s4095_s1 + $0x50] sm:$0xff]  }
   0x6   :  { %2754 = vmatprep.subr.bf16.mxu1 %v3089_v6  ;;  %v3096_v13 = vld [vmem:[%s4095_s1 + $0x20] sm:$0xff]   ;;  %v3100_v17 = vld [vmem:[%s4095_s1 + $0x18] sm:$0xff]   ;;  %v3104_v21 = vld [vmem:[%s4095_s1 + $0x10] sm:$0xff]  }
   0x7   :  { %2733 = vmatpush3.bf16.msra.mxu0 %v3088_v5  ;;  %v3097_v14 = vld [vmem:[%s4095_s1 + $0xe0] sm:$0xff]   ;;  %v3101_v18 = vld [vmem:[%s4095_s1 + $0xd8] sm:$0xff]   ;;  %v3105_v22 = vld [vmem:[%s4095_s1 + $0xd0] sm:$0xff]  }
   0x8   :  { %2734 = vmatprep.subr.bf16.mxu0 %v3091_v8  ;;  %v3098_v15 = vld [vmem:[%s4095_s1 + $0xa0] sm:$0xff]   ;;  %v3102_v19 = vld [vmem:[%s4095_s1 + $0x98] sm:$0xff]   ;;  %v3106_v23 = vld [vmem:[%s4095_s1 + $0x90] sm:$0xff]  }
   0x9   :  { %2755 = vmatpush3.bf16.msra.mxu1 %v3090_v7  ;;  %v3107_v24 = vld [vmem:[%s4095_s1 + $0x48] sm:$0xff]   ;;  %v3111_v28 = vld [vmem:[%s4095_s1 + $0x40] sm:$0xff]   ;;  %v3117_v35 = vld [vmem:[%s4095_s1 + $0x178] sm:$0xff]  }
   0xa   :  { %2756 = vmatprep.subr.bf16.mxu1 %v3093_v10  ;;  %v3108_v25 = vld [vmem:[%s4095_s1 + $0x8] sm:$0xff]   ;;  %v3112_v29 = vld [vmem:[%s4095_s1] sm:$0xff]   ;;  %v3120_v39 = vld [vmem:[%s4095_s1 + $0x138] sm:$0xff]  }
   0xb   :  { %2735 = vmatpush3.bf16.msra.mxu0 %v3092_v9  ;;  %v3109_v26 = vld [vmem:[%s4095_s1 + $0xc8] sm:$0xff]   ;;  %v3113_v30 = vld [vmem:[%s4095_s1 + $0xc0] sm:$0xff]   ;;  %v3121_v40 = vld [vmem:[%s4095_s1 + $0x1f8] sm:$0xff]  }
   0xc   :  { %2736 = vmatprep.subr.bf16.mxu0 %v3095_v12  ;;  %v3110_v27 = vld [vmem:[%s4095_s1 + $0x88] sm:$0xff]   ;;  %v27_v31 = vld [vmem:[%s4096_s0] sm:$0xff]  ;;  %v3122_v41 = vld [vmem:[%s4095_s1 + $0x1b8] sm:$0xff]  }
   0xd   :  { %2757 = vmatpush3.bf16.msra.mxu1 %v3094_v11  ;;  %v2487_v32 = vcombine.low %v27_v31, %v27_v31  ;;  %v2488_v33 = vcombine.high %v27_v31, %v27_v31  ;;  %v3116_v34 = vld [vmem:[%s4095_s1 + $0x80] sm:$0xff]   ;;  %v28_v36 = vld [vmem:[%s4096_s0 + $0x8] sm:$0xff]  ;;  %v3123_v42 = vld [vmem:[%s4095_s1 + $0x170] sm:$0xff]  }
   0xe   :  { %2758 = vmatprep.subr.bf16.mxu1 %v3097_v14  ;;  %v2489_v37 = vcombine.low %v28_v36, %v28_v36  ;;  %v2490_v38 = vcombine.high %v28_v36, %v28_v36  ;;  %v3124_v43 = vld [vmem:[%s4095_s1 + $0x130] sm:$0xff]   ;;  %v3127_v46 = vld [vmem:[%s4095_s1 + $0x168] sm:$0xff]   ;;  %v3131_v50 = vld [vmem:[%s4095_s1 + $0x160] sm:$0xff]  }
   0xf   :  { %2737 = vmatpush3.bf16.msra.mxu0 %v3096_v13  ;;  %1767 = vmatprep.mubr.bf16.mxu0 %v2488_v33  ;;  %v3125_v44 = vld [vmem:[%s4095_s1 + $0x1f0] sm:$0xff]   ;;  %v3128_v47 = vld [vmem:[%s4095_s1 + $0x128] sm:$0xff]   ;;  %v3132_v51 = vld [vmem:[%s4095_s1 + $0x120] sm:$0xff]  }
  0x10   :  { %2738 = vmatprep.subr.bf16.mxu0 %v3099_v16  ;;  %1807 = vmatprep.mubr.bf16.mxu1 %v2490_v38  ;;  %v3126_v45 = vld [vmem:[%s4095_s1 + $0x1b0] sm:$0xff]   ;;  %v3129_v48 = vld [vmem:[%s4095_s1 + $0x1e8] sm:$0xff]   ;;  %v3133_v52 = vld [vmem:[%s4095_s1 + $0x1e0] sm:$0xff]  }
  0x11   :  { %2759 = vmatpush3.bf16.msra.mxu1 %v3098_v15  ;;  %v3130_v49 = vld [vmem:[%s4095_s1 + $0x1a8] sm:$0xff]   ;;  %v3134_v53 = vld [vmem:[%s4095_s1 + $0x1a0] sm:$0xff]   ;;  %v3135_v54 = vld [vmem:[%s4095_s1 + $0x158] sm:$0xff]  }
  0x12   :  { %2760 = vmatprep.subr.bf16.mxu1 %v3101_v18  ;;  %v3136_v55 = vld [vmem:[%s4095_s1 + $0x118] sm:$0xff]   ;;  %v3139_v58 = vld [vmem:[%s4095_s1 + $0x150] sm:$0xff]   ;;  %v3143_v62 = vld [vmem:[%s4095_s1 + $0x148] sm:$0xff]  }
  0x13   :  { %2739 = vmatpush3.bf16.msra.mxu0 %v3100_v17  ;;  %v3137_v56 = vld [vmem:[%s4095_s1 + $0x1d8] sm:$0xff]   ;;  %v3140_v59 = vld [vmem:[%s4095_s1 + $0x110] sm:$0xff]   ;;  %v3144_v63 = vld [vmem:[%s4095_s1 + $0x108] sm:$0xff]  }
  0x14   :  { %2740 = vmatprep.subr.bf16.mxu0 %v3103_v20  ;;  %v3138_v57 = vld [vmem:[%s4095_s1 + $0x198] sm:$0xff]   ;;  %v3141_v60 = vld [vmem:[%s4095_s1 + $0x1d0] sm:$0xff]   ;;  %v3145_v0 = vld [vmem:[%s4095_s1 + $0x1c8] sm:$0xff]  }
  0x15   :  { %2761 = vmatpush3.bf16.msra.mxu1 %v3102_v19  ;;  %v3142_v61 = vld [vmem:[%s4095_s1 + $0x190] sm:$0xff]   ;;  %v3146_v1 = vld [vmem:[%s4095_s1 + $0x188] sm:$0xff]   ;;  %v3147_v2 = vld [vmem:[%s4095_s1 + $0x140] sm:$0xff]  }
  0x16   :  { %2762 = vmatprep.subr.bf16.mxu1 %v3105_v22  ;;  %v3148_v3 = vld [vmem:[%s4095_s1 + $0x100] sm:$0xff]   ;;  %v29_v5 = vld [vmem:[%s4096_s0 + $0x10] sm:$0xff]  ;;  %v3153_v9 = vld [vmem:[%s4095_s1 + $0x278] sm:$0xff]  }
  0x17   :  { %2741 = vmatpush3.bf16.msra.mxu0 %v3104_v21  ;;  %v3149_v4 = vld [vmem:[%s4095_s1 + $0x1c0] sm:$0xff]   ;;  %v2491_v6 = vcombine.low %v29_v5, %v29_v5  ;;  %v2492_v7 = vcombine.high %v29_v5, %v29_v5  ;;  %v30_v10 = vld [vmem:[%s4096_s0 + $0x18] sm:$0xff]  ;;  %v3159_v16 = vld [vmem:[%s4095_s1 + $0x270] sm:$0xff]  }
  0x18   :  { %2742 = vmatprep.subr.bf16.mxu0 %v3107_v24  ;;  %v3152_v8 = vld [vmem:[%s4095_s1 + $0x180] sm:$0xff]   ;;  %v2493_v11 = vcombine.low %v30_v10, %v30_v10  ;;  %v2494_v12 = vcombine.high %v30_v10, %v30_v10  ;;  %v3156_v13 = vld [vmem:[%s4095_s1 + $0x238] sm:$0xff]   ;;  %v3160_v17 = vld [vmem:[%s4095_s1 + $0x230] sm:$0xff]  }
  0x19   :  { %2763 = vmatpush3.bf16.msra.mxu1 %v3106_v23  ;;  %v3157_v14 = vld [vmem:[%s4095_s1 + $0x2f8] sm:$0xff]   ;;  %v3161_v18 = vld [vmem:[%s4095_s1 + $0x2f0] sm:$0xff]   ;;  %v3163_v20 = vld [vmem:[%s4095_s1 + $0x268] sm:$0xff]  }
  0x1a   :  { %2764 = vmatprep.subr.bf16.mxu1 %v3109_v26  ;;  %v3158_v15 = vld [vmem:[%s4095_s1 + $0x2b8] sm:$0xff]   ;;  %v3162_v19 = vld [vmem:[%s4095_s1 + $0x2b0] sm:$0xff]   ;;  %v3164_v21 = vld [vmem:[%s4095_s1 + $0x228] sm:$0xff]  }
  0x1b   :  { %2743 = vmatpush3.bf16.msra.mxu0 %v3108_v25  ;;  %v3165_v22 = vld [vmem:[%s4095_s1 + $0x2e8] sm:$0xff]   ;;  %v3167_v24 = vld [vmem:[%s4095_s1 + $0x260] sm:$0xff]   ;;  %v3174_v31 = vld [vmem:[%s4095_s1 + $0x298] sm:$0xff]  }
  0x1c   :  { %2744 = vmatprep.subr.bf16.mxu0 %v3111_v28  ;;  %v3166_v23 = vld [vmem:[%s4095_s1 + $0x2a8] sm:$0xff]   ;;  %v3168_v25 = vld [vmem:[%s4095_s1 + $0x220] sm:$0xff]   ;;  %v3171_v28 = vld [vmem:[%s4095_s1 + $0x258] sm:$0xff]  }
  0x1d   :  { %2765 = vmatpush3.bf16.msra.mxu1 %v3110_v27  ;;  %v3169_v26 = vld [vmem:[%s4095_s1 + $0x2e0] sm:$0xff]   ;;  %v3176_v33 = vld [vmem:[%s4095_s1 + $0x210] sm:$0xff]   ;;  %v3179_v36 = vld [vmem:[%s4095_s1 + $0x248] sm:$0xff]  }
  0x1e   :  { %2766 = vmatprep.subr.bf16.mxu1 %v3113_v30  ;;  %v3170_v27 = vld [vmem:[%s4095_s1 + $0x2a0] sm:$0xff]   ;;  %v3173_v30 = vld [vmem:[%s4095_s1 + $0x2d8] sm:$0xff]   ;;  %v3181_v38 = vld [vmem:[%s4095_s1 + $0x2c8] sm:$0xff]  }
  0x1f   :  { %2745 = vmatpush3.bf16.msra.mxu0 %v3112_v29  ;;  %v3172_v29 = vld [vmem:[%s4095_s1 + $0x218] sm:$0xff]   ;;  %v3215_v10 = vld [vmem:[%s4095_s1 + $0x348] sm:$0xff]  }
  0x20   :  { %2774 = vmatprep.subr.bf16.mxu0 %v3117_v35  ;;  %v3178_v35 = vld [vmem:[%s4095_s1 + $0x290] sm:$0xff]   ;;  %v3210_v5 = vld [vmem:[%s4095_s1 + $0x398] sm:$0xff]  }
  0x21   :  { %2767 = vmatpush3.bf16.msra.mxu1 %v3116_v34  ;;  %v3177_v34 = vld [vmem:[%s4095_s1 + $0x2d0] sm:$0xff]  }
  0x22   :  { %1768 = vmatmul.mubr.bf16.vlgmr.msra.gmra.mxu0 %v2487_v32  ;;  %2796 = vmatprep.subr.bf16.mxu1 %v3121_v40  ;;  %v3175_v32 = vld [vmem:[%s4095_s1 + $0x250] sm:$0xff]   ;;  %v3183_v40 = vld [vmem:[%s4095_s1 + $0x240] sm:$0xff]  }
  0x23   :  { %2775 = vmatpush3.bf16.msra.mxu0 %v3120_v39  ;;  %1847 = vmatprep.mubr.bf16.mxu0 %v2492_v7  ;;  %v3182_v39 = vld [vmem:[%s4095_s1 + $0x288] sm:$0xff]   ;;  %v3212_v7 = vld [vmem:[%s4095_s1 + $0x310] sm:$0xff]  }
  0x24   :  { %1808 = vmatmul.mubr.bf16.vlgmr.msra.gmra.mxu1 %v2489_v37  ;;  %2776 = vmatprep.subr.bf16.mxu0 %v3123_v42  ;;  %v3180_v37 = vld [vmem:[%s4095_s1 + $0x208] sm:$0xff]   ;;  %v3185_v42 = vld [vmem:[%s4095_s1 + $0x2c0] sm:$0xff]  }
  0x25   :  { %2797 = vmatpush3.bf16.msra.mxu1 %v3122_v41  ;;  %1887 = vmatprep.mubr.bf16.mxu1 %v2494_v12  ;;  %v3184_v41 = vld [vmem:[%s4095_s1 + $0x200] sm:$0xff]   ;;  %v3217_v12 = vld [vmem:[%s4095_s1 + $0x3c8] sm:$0xff]  }
  0x26   :  { %2798 = vmatprep.subr.bf16.mxu1 %v3125_v44 }
  0x27   :  { %2777 = vmatpush3.bf16.msra.mxu0 %v3124_v43  ;;  %v31_v43 = vld [vmem:[%s4096_s0 + $0x20] sm:$0xff] }
  0x28   :  { %2778 = vmatprep.subr.bf16.mxu0 %v3127_v46  ;;  %v2495_v44 = vcombine.low %v31_v43, %v31_v43  ;;  %v3188_v46 = vld [vmem:[%s4095_s1 + $0x280] sm:$0xff]  }
  0x29   :  { %2799 = vmatpush3.bf16.msra.mxu1 %v3126_v45  ;;  %v2496_v45 = vcombine.high %v31_v43, %v31_v43  ;;  %v3246_v43 = vld [vmem:[%s4095_s1 + $0x498] sm:$0xff]  }
  0x2a   :  { %2800 = vmatprep.subr.bf16.mxu1 %v3129_v48  ;;  %v32_v48 = vld [vmem:[%s4096_s0 + $0x28] sm:$0xff] }
  0x2b   :  { %2779 = vmatpush3.bf16.msra.mxu0 %v3128_v47  ;;  %v3189_v47 = vld [vmem:[%s4095_s1 + $0x378] sm:$0xff]  }
  0x2c   :  { %2780 = vmatprep.subr.bf16.mxu0 %v3131_v50  ;;  %v2498_v50 = vcombine.high %v32_v48, %v32_v48 }
  0x2d   :  { %2801 = vmatpush3.bf16.msra.mxu1 %v3130_v49  ;;  %v2497_v49 = vcombine.low %v32_v48, %v32_v48  ;;  %v3251_v48 = vld [vmem:[%s4095_s1 + $0x448] sm:$0xff]  }
  0x2e   :  { %2802 = vmatprep.subr.bf16.mxu1 %v3133_v52  ;;  %v3193_v52 = vld [vmem:[%s4095_s1 + $0x3f8] sm:$0xff]  }
  0x2f   :  { %2781 = vmatpush3.bf16.msra.mxu0 %v3132_v51  ;;  %v3192_v51 = vld [vmem:[%s4095_s1 + $0x338] sm:$0xff]  }
  0x30   :  { %2782 = vmatprep.subr.bf16.mxu0 %v3135_v54  ;;  %v3195_v54 = vld [vmem:[%s4095_s1 + $0x370] sm:$0xff]  }
  0x31   :  { %2803 = vmatpush3.bf16.msra.mxu1 %v3134_v53  ;;  %v3194_v53 = vld [vmem:[%s4095_s1 + $0x3b8] sm:$0xff]  }
  0x32   :  { %2804 = vmatprep.subr.bf16.mxu1 %v3137_v56  ;;  %v3197_v56 = vld [vmem:[%s4095_s1 + $0x3f0] sm:$0xff]  }
  0x33   :  { %2783 = vmatpush3.bf16.msra.mxu0 %v3136_v55  ;;  %v3196_v55 = vld [vmem:[%s4095_s1 + $0x330] sm:$0xff]  }
  0x34   :  { %2784 = vmatprep.subr.bf16.mxu0 %v3139_v58  ;;  %v3199_v58 = vld [vmem:[%s4095_s1 + $0x368] sm:$0xff]  }
  0x35   :  { %2805 = vmatpush3.bf16.msra.mxu1 %v3138_v57  ;;  %v3198_v57 = vld [vmem:[%s4095_s1 + $0x3b0] sm:$0xff]  }
  0x36   :  { %2806 = vmatprep.subr.bf16.mxu1 %v3141_v60  ;;  %v3201_v60 = vld [vmem:[%s4095_s1 + $0x3e8] sm:$0xff]  }
  0x37   :  { %2785 = vmatpush3.bf16.msra.mxu0 %v3140_v59  ;;  %v3200_v59 = vld [vmem:[%s4095_s1 + $0x328] sm:$0xff]  }
  0x38   :  { %2786 = vmatprep.subr.bf16.mxu0 %v3143_v62  ;;  %v3203_v62 = vld [vmem:[%s4095_s1 + $0x360] sm:$0xff]  }
  0x39   :  { %2807 = vmatpush3.bf16.msra.mxu1 %v3142_v61  ;;  %v3202_v61 = vld [vmem:[%s4095_s1 + $0x3a8] sm:$0xff]  }
  0x3a   :  { %2808 = vmatprep.subr.bf16.mxu1 %v3145_v0  ;;  %v3205_v0 = vld [vmem:[%s4095_s1 + $0x3e0] sm:$0xff]  }
  0x3b   :  { %2787 = vmatpush3.bf16.msra.mxu0 %v3144_v63  ;;  %v3204_v63 = vld [vmem:[%s4095_s1 + $0x320] sm:$0xff]  }
  0x3c   :  { %2788 = vmatprep.subr.bf16.mxu0 %v3147_v2  ;;  %v3207_v2 = vld [vmem:[%s4095_s1 + $0x358] sm:$0xff]  }
  0x3d   :  { %2809 = vmatpush3.bf16.msra.mxu1 %v3146_v1  ;;  %v3206_v1 = vld [vmem:[%s4095_s1 + $0x3a0] sm:$0xff]  }
  0x3e   :  { %2810 = vmatprep.subr.bf16.mxu1 %v3149_v4  ;;  %v3209_v4 = vld [vmem:[%s4095_s1 + $0x3d8] sm:$0xff]  }
  0x3f   :  { %2789 = vmatpush3.bf16.msra.mxu0 %v3148_v3  ;;  %v3208_v3 = vld [vmem:[%s4095_s1 + $0x318] sm:$0xff]  }
  0x40   :  { %2818 = vmatprep.subr.bf16.mxu0 %v3153_v9  ;;  %v3214_v9 = vld [vmem:[%s4095_s1 + $0x390] sm:$0xff]  }
  0x41   :  { %2811 = vmatpush3.bf16.msra.mxu1 %v3152_v8  ;;  %v3213_v8 = vld [vmem:[%s4095_s1 + $0x3d0] sm:$0xff]  }
  0x42   :  { %1848 = vmatmul.mubr.bf16.vlgmr.msra.gmra.mxu0 %v2491_v6  ;;  %2840 = vmatprep.subr.bf16.mxu1 %v3157_v14  ;;  %v3211_v6 = vld [vmem:[%s4095_s1 + $0x350] sm:$0xff]   ;;  %v3219_v14 = vld [vmem:[%s4095_s1 + $0x340] sm:$0xff]  }
  0x43   :  { %2819 = vmatpush3.bf16.msra.mxu0 %v3156_v13  ;;  %1927 = vmatprep.mubr.bf16.mxu0 %v2496_v45  ;;  %v3218_v13 = vld [vmem:[%s4095_s1 + $0x388] sm:$0xff]   ;;  %v3248_v45 = vld [vmem:[%s4095_s1 + $0x410] sm:$0xff]  }
  0x44   :  { %1888 = vmatmul.mubr.bf16.vlgmr.msra.gmra.mxu1 %v2493_v11  ;;  %2820 = vmatprep.subr.bf16.mxu0 %v3159_v16  ;;  %v3216_v11 = vld [vmem:[%s4095_s1 + $0x308] sm:$0xff]   ;;  %v3221_v16 = vld [vmem:[%s4095_s1 + $0x3c0] sm:$0xff]  }
  0x45   :  { %2841 = vmatpush3.bf16.msra.mxu1 %v3158_v15  ;;  %1967 = vmatprep.mubr.bf16.mxu1 %v2498_v50  ;;  %v3220_v15 = vld [vmem:[%s4095_s1 + $0x300] sm:$0xff]   ;;  %v3253_v50 = vld [vmem:[%s4095_s1 + $0x4c8] sm:$0xff]  }
  0x46   :  { %2842 = vmatprep.subr.bf16.mxu1 %v3161_v18 }
  0x47   :  { %2821 = vmatpush3.bf16.msra.mxu0 %v3160_v17  ;;  %v33_v17 = vld [vmem:[%s4096_s0 + $0x30] sm:$0xff] }
  0x48   :  { %2822 = vmatprep.subr.bf16.mxu0 %v3163_v20  ;;  %v2499_v18 = vcombine.low %v33_v17, %v33_v17  ;;  %v3224_v20 = vld [vmem:[%s4095_s1 + $0x380] sm:$0xff]  }
  0x49   :  { %2843 = vmatpush3.bf16.msra.mxu1 %v3162_v19  ;;  %v2500_v19 = vcombine.high %v33_v17, %v33_v17  ;;  %v3282_v17 = vld [vmem:[%s4095_s1 + $0x598] sm:$0xff]  }
  0x4a   :  { %2844 = vmatprep.subr.bf16.mxu1 %v3165_v22  ;;  %v34_v22 = vld [vmem:[%s4096_s0 + $0x38] sm:$0xff] }
  0x4b   :  { %2823 = vmatpush3.bf16.msra.mxu0 %v3164_v21  ;;  %v3225_v21 = vld [vmem:[%s4095_s1 + $0x478] sm:$0xff]  }
  0x4c   :  { %2824 = vmatprep.subr.bf16.mxu0 %v3167_v24  ;;  %v2502_v24 = vcombine.high %v34_v22, %v34_v22 }
  0x4d   :  { %2845 = vmatpush3.bf16.msra.mxu1 %v3166_v23  ;;  %v2501_v23 = vcombine.low %v34_v22, %v34_v22  ;;  %v3287_v22 = vld [vmem:[%s4095_s1 + $0x548] sm:$0xff]  }
  0x4e   :  { %2846 = vmatprep.subr.bf16.mxu1 %v3169_v26  ;;  %v3229_v26 = vld [vmem:[%s4095_s1 + $0x4f8] sm:$0xff]  }
  0x4f   :  { %2825 = vmatpush3.bf16.msra.mxu0 %v3168_v25  ;;  %v3228_v25 = vld [vmem:[%s4095_s1 + $0x438] sm:$0xff]  }
  0x50   :  { %2826 = vmatprep.subr.bf16.mxu0 %v3171_v28  ;;  %v3231_v28 = vld [vmem:[%s4095_s1 + $0x470] sm:$0xff]  }
  0x51   :  { %2847 = vmatpush3.bf16.msra.mxu1 %v3170_v27  ;;  %v3230_v27 = vld [vmem:[%s4095_s1 + $0x4b8] sm:$0xff]  }
  0x52   :  { %2848 = vmatprep.subr.bf16.mxu1 %v3173_v30  ;;  %v3233_v30 = vld [vmem:[%s4095_s1 + $0x4f0] sm:$0xff]  }
  0x53   :  { %2827 = vmatpush3.bf16.msra.mxu0 %v3172_v29  ;;  %v3232_v29 = vld [vmem:[%s4095_s1 + $0x430] sm:$0xff]  }
  0x54   :  { %2828 = vmatprep.subr.bf16.mxu0 %v3175_v32  ;;  %v3235_v32 = vld [vmem:[%s4095_s1 + $0x468] sm:$0xff]  }
  0x55   :  { %2849 = vmatpush3.bf16.msra.mxu1 %v3174_v31  ;;  %v3234_v31 = vld [vmem:[%s4095_s1 + $0x4b0] sm:$0xff]  }
  0x56   :  { %2850 = vmatprep.subr.bf16.mxu1 %v3177_v34  ;;  %v3237_v34 = vld [vmem:[%s4095_s1 + $0x4e8] sm:$0xff]  }
  0x57   :  { %2829 = vmatpush3.bf16.msra.mxu0 %v3176_v33  ;;  %v3236_v33 = vld [vmem:[%s4095_s1 + $0x428] sm:$0xff]  }
  0x58   :  { %2830 = vmatprep.subr.bf16.mxu0 %v3179_v36  ;;  %v3239_v36 = vld [vmem:[%s4095_s1 + $0x460] sm:$0xff]  }
  0x59   :  { %2851 = vmatpush3.bf16.msra.mxu1 %v3178_v35  ;;  %v3238_v35 = vld [vmem:[%s4095_s1 + $0x4a8] sm:$0xff]  }
  0x5a   :  { %2852 = vmatprep.subr.bf16.mxu1 %v3181_v38  ;;  %v3241_v38 = vld [vmem:[%s4095_s1 + $0x4e0] sm:$0xff]  }
  0x5b   :  { %2831 = vmatpush3.bf16.msra.mxu0 %v3180_v37  ;;  %v3240_v37 = vld [vmem:[%s4095_s1 + $0x420] sm:$0xff]  }
  0x5c   :  { %2832 = vmatprep.subr.bf16.mxu0 %v3183_v40  ;;  %v3243_v40 = vld [vmem:[%s4095_s1 + $0x458] sm:$0xff]  }
  0x5d   :  { %2853 = vmatpush3.bf16.msra.mxu1 %v3182_v39  ;;  %v3242_v39 = vld [vmem:[%s4095_s1 + $0x4a0] sm:$0xff]  }
  0x5e   :  { %2854 = vmatprep.subr.bf16.mxu1 %v3185_v42  ;;  %v3245_v42 = vld [vmem:[%s4095_s1 + $0x4d8] sm:$0xff]  }
  0x5f   :  { %2833 = vmatpush3.bf16.msra.mxu0 %v3184_v41  ;;  %v3244_v41 = vld [vmem:[%s4095_s1 + $0x418] sm:$0xff]  }
  0x60   :  { %2862 = vmatprep.subr.bf16.mxu0 %v3189_v47  ;;  %v3250_v47 = vld [vmem:[%s4095_s1 + $0x490] sm:$0xff]  }
  0x61   :  { %2855 = vmatpush3.bf16.msra.mxu1 %v3188_v46  ;;  %v3249_v46 = vld [vmem:[%s4095_s1 + $0x4d0] sm:$0xff]  }
  0x62   :  { %1928 = vmatmul.mubr.bf16.vlgmr.msra.gmra.mxu0 %v2495_v44  ;;  %2884 = vmatprep.subr.bf16.mxu1 %v3193_v52  ;;  %v3247_v44 = vld [vmem:[%s4095_s1 + $0x450] sm:$0xff]   ;;  %v3255_v52 = vld [vmem:[%s4095_s1 + $0x440] sm:$0xff]  }
  0x63   :  { %2863 = vmatpush3.bf16.msra.mxu0 %v3192_v51  ;;  %2007 = vmatprep.mubr.bf16.mxu0 %v2500_v19  ;;  %v3254_v51 = vld [vmem:[%s4095_s1 + $0x488] sm:$0xff]   ;;  %v3284_v19 = vld [vmem:[%s4095_s1 + $0x510] sm:$0xff]  }
  0x64   :  { %1968 = vmatmul.mubr.bf16.vlgmr.msra.gmra.mxu1 %v2497_v49  ;;  %2864 = vmatprep.subr.bf16.mxu0 %v3195_v54  ;;  %v3252_v49 = vld [vmem:[%s4095_s1 + $0x408] sm:$0xff]   ;;  %v3257_v54 = vld [vmem:[%s4095_s1 + $0x4c0] sm:$0xff]  }
  0x65   :  { %2885 = vmatpush3.bf16.msra.mxu1 %v3194_v53  ;;  %2047 = vmatprep.mubr.bf16.mxu1 %v2502_v24  ;;  %v3256_v53 = vld [vmem:[%s4095_s1 + $0x400] sm:$0xff]   ;;  %v3289_v24 = vld [vmem:[%s4095_s1 + $0x5c8] sm:$0xff]  }
  0x66   :  { %2886 = vmatprep.subr.bf16.mxu1 %v3197_v56 }
  0x67   :  { %2865 = vmatpush3.bf16.msra.mxu0 %v3196_v55  ;;  %v35_v55 = vld [vmem:[%s4096_s0 + $0x40] sm:$0xff] }
  0x68   :  { %2866 = vmatprep.subr.bf16.mxu0 %v3199_v58  ;;  %v2503_v56 = vcombine.low %v35_v55, %v35_v55  ;;  %v3260_v58 = vld [vmem:[%s4095_s1 + $0x480] sm:$0xff]  }
  0x69   :  { %2887 = vmatpush3.bf16.msra.mxu1 %v3198_v57  ;;  %v2504_v57 = vcombine.high %v35_v55, %v35_v55 }
  0x6a   :  { %2888 = vmatprep.subr.bf16.mxu1 %v3201_v60  ;;  %v36_v60 = vld [vmem:[%s4096_s0 + $0x48] sm:$0xff] }
  0x6b   :  { %2867 = vmatpush3.bf16.msra.mxu0 %v3200_v59  ;;  %v3261_v59 = vld [vmem:[%s4095_s1 + $0x578] sm:$0xff]  }
  0x6c   :  { %2868 = vmatprep.subr.bf16.mxu0 %v3203_v62  ;;  %v2506_v62 = vcombine.high %v36_v60, %v36_v60 }
  0x6d   :  { %2889 = vmatpush3.bf16.msra.mxu1 %v3202_v61  ;;  %v2505_v61 = vcombine.low %v36_v60, %v36_v60 }
  0x6e   :  { %2890 = vmatprep.subr.bf16.mxu1 %v3205_v0  ;;  %v3265_v0 = vld [vmem:[%s4095_s1 + $0x5f8] sm:$0xff]  }
  0x6f   :  { %2869 = vmatpush3.bf16.msra.mxu0 %v3204_v63  ;;  %v3264_v63 = vld [vmem:[%s4095_s1 + $0x538] sm:$0xff]  }
  0x70   :  { %2870 = vmatprep.subr.bf16.mxu0 %v3207_v2  ;;  %v3267_v2 = vld [vmem:[%s4095_s1 + $0x570] sm:$0xff]  }
  0x71   :  { %2891 = vmatpush3.bf16.msra.mxu1 %v3206_v1  ;;  %v3266_v1 = vld [vmem:[%s4095_s1 + $0x5b8] sm:$0xff]  }
  0x72   :  { %2892 = vmatprep.subr.bf16.mxu1 %v3209_v4  ;;  %v3269_v4 = vld [vmem:[%s4095_s1 + $0x5f0] sm:$0xff]  }
  0x73   :  { %2871 = vmatpush3.bf16.msra.mxu0 %v3208_v3  ;;  %v3268_v3 = vld [vmem:[%s4095_s1 + $0x530] sm:$0xff]  }
  0x74   :  { %2872 = vmatprep.subr.bf16.mxu0 %v3211_v6  ;;  %v3271_v6 = vld [vmem:[%s4095_s1 + $0x568] sm:$0xff]  }
  0x75   :  { %2893 = vmatpush3.bf16.msra.mxu1 %v3210_v5  ;;  %v3270_v5 = vld [vmem:[%s4095_s1 + $0x5b0] sm:$0xff]  }
  0x76   :  { %2894 = vmatprep.subr.bf16.mxu1 %v3213_v8  ;;  %v3273_v8 = vld [vmem:[%s4095_s1 + $0x5e8] sm:$0xff]  }
  0x77   :  { %2873 = vmatpush3.bf16.msra.mxu0 %v3212_v7  ;;  %v3272_v7 = vld [vmem:[%s4095_s1 + $0x528] sm:$0xff]  }
  0x78   :  { %2874 = vmatprep.subr.bf16.mxu0 %v3215_v10  ;;  %v3275_v10 = vld [vmem:[%s4095_s1 + $0x560] sm:$0xff]  }
  0x79   :  { %2895 = vmatpush3.bf16.msra.mxu1 %v3214_v9  ;;  %v3274_v9 = vld [vmem:[%s4095_s1 + $0x5a8] sm:$0xff]  }
  0x7a   :  { %2896 = vmatprep.subr.bf16.mxu1 %v3217_v12  ;;  %v3277_v12 = vld [vmem:[%s4095_s1 + $0x5e0] sm:$0xff]  }
  0x7b   :  { %2875 = vmatpush3.bf16.msra.mxu0 %v3216_v11  ;;  %v3276_v11 = vld [vmem:[%s4095_s1 + $0x520] sm:$0xff]  }
  0x7c   :  { %2876 = vmatprep.subr.bf16.mxu0 %v3219_v14  ;;  %v3279_v14 = vld [vmem:[%s4095_s1 + $0x558] sm:$0xff]  }
  0x7d   :  { %2897 = vmatpush3.bf16.msra.mxu1 %v3218_v13  ;;  %v3278_v13 = vld [vmem:[%s4095_s1 + $0x5a0] sm:$0xff]  }
  0x7e   :  { %2898 = vmatprep.subr.bf16.mxu1 %v3221_v16  ;;  %v3281_v16 = vld [vmem:[%s4095_s1 + $0x5d8] sm:$0xff]  }
  0x7f   :  { %2877 = vmatpush3.bf16.msra.mxu0 %v3220_v15  ;;  %v3280_v15 = vld [vmem:[%s4095_s1 + $0x518] sm:$0xff]  }
  0x80   :  { %2906 = vmatprep.subr.bf16.mxu0 %v3225_v21  ;;  %v3286_v21 = vld [vmem:[%s4095_s1 + $0x590] sm:$0xff]  }
  0x81   :  { %2899 = vmatpush3.bf16.msra.mxu1 %v3224_v20  ;;  %v3285_v20 = vld [vmem:[%s4095_s1 + $0x5d0] sm:$0xff]  }
  0x82   :  { %2008 = vmatmul.mubr.bf16.vlgmr.msra.gmra.mxu0 %v2499_v18  ;;  %2928 = vmatprep.subr.bf16.mxu1 %v3229_v26  ;;  %v3283_v18 = vld [vmem:[%s4095_s1 + $0x550] sm:$0xff]   ;;  %v3291_v26 = vld [vmem:[%s4095_s1 + $0x540] sm:$0xff]  }
  0x83   :  { %2907 = vmatpush3.bf16.msra.mxu0 %v3228_v25  ;;  %2087 = vmatprep.mubr.bf16.mxu0 %v2504_v57  ;;  %v3290_v25 = vld [vmem:[%s4095_s1 + $0x588] sm:$0xff]  }
  0x84   :  { %2048 = vmatmul.mubr.bf16.vlgmr.msra.gmra.mxu1 %v2501_v23  ;;  %2908 = vmatprep.subr.bf16.mxu0 %v3231_v28  ;;  %v3288_v23 = vld [vmem:[%s4095_s1 + $0x508] sm:$0xff]   ;;  %v3293_v28 = vld [vmem:[%s4095_s1 + $0x5c0] sm:$0xff]  }
  0x85   :  { %2929 = vmatpush3.bf16.msra.mxu1 %v3230_v27  ;;  %2127 = vmatprep.mubr.bf16.mxu1 %v2506_v62  ;;  %v3292_v27 = vld [vmem:[%s4095_s1 + $0x500] sm:$0xff]  }
  0x86   :  { %2930 = vmatprep.subr.bf16.mxu1 %v3233_v30 }
  0x87   :  { %2909 = vmatpush3.bf16.msra.mxu0 %v3232_v29  ;;  %v37_v29 = vld [vmem:[%s4096_s0 + $0x50] sm:$0xff] }
  0x88   :  { %2910 = vmatprep.subr.bf16.mxu0 %v3235_v32  ;;  %v2507_v30 = vcombine.low %v37_v29, %v37_v29  ;;  %v3296_v32 = vld [vmem:[%s4095_s1 + $0x580] sm:$0xff]  }
  0x89   :  { %2931 = vmatpush3.bf16.msra.mxu1 %v3234_v31  ;;  %v2508_v31 = vcombine.high %v37_v29, %v37_v29  ;;  %v3318_v29 = vld [vmem:[%s4099_s5 + $0x28] sm:$0xff]  }
  0x8a   :  { %2932 = vmatprep.subr.bf16.mxu1 %v3237_v34  ;;  %v3324_v34 = vmov 0.0  }
  0x8b   :  { %2911 = vmatpush3.bf16.msra.mxu0 %v3236_v33  ;;  %v38_v33 = vld [vmem:[%s4096_s0 + $0x58] sm:$0xff] }
  0x8c   :  { %2912 = vmatprep.subr.bf16.mxu0 %v3239_v36  ;;  %v2510_v36 = vcombine.high %v38_v33, %v38_v33 }
  0x8d   :  { %2933 = vmatpush3.bf16.msra.mxu1 %v3238_v35  ;;  %v2509_v35 = vcombine.low %v38_v33, %v38_v33 }
  0x8e   :  { %2934 = vmatprep.subr.bf16.mxu1 %v3241_v38  ;;  %v3300_v38 = vld [vmem:[%s4095_s1 + $0x630] sm:$0xff]  }
  0x8f   :  { %2913 = vmatpush3.bf16.msra.mxu0 %v3240_v37  ;;  %v3299_v37 = vld [vmem:[%s4095_s1 + $0x638] sm:$0xff]  }
  0x90   :  { %2914 = vmatprep.subr.bf16.mxu0 %v3243_v40  ;;  %v3302_v40 = vld [vmem:[%s4095_s1 + $0x620] sm:$0xff]  }
  0x91   :  { %2935 = vmatpush3.bf16.msra.mxu1 %v3242_v39  ;;  %v3301_v39 = vld [vmem:[%s4095_s1 + $0x628] sm:$0xff]  }
  0x92   :  { %2936 = vmatprep.subr.bf16.mxu1 %v3245_v42  ;;  %v3304_v42 = vld [vmem:[%s4095_s1 + $0x610] sm:$0xff]  }
  0x93   :  { %2915 = vmatpush3.bf16.msra.mxu0 %v3244_v41  ;;  %v3303_v41 = vld [vmem:[%s4095_s1 + $0x618] sm:$0xff]  }
  0x94   :  { %2916 = vmatprep.subr.bf16.mxu0 %v3247_v44  ;;  %v3306_v44 = vld [vmem:[%s4095_s1 + $0x600] sm:$0xff]  }
  0x95   :  { %2937 = vmatpush3.bf16.msra.mxu1 %v3246_v43  ;;  %v3305_v43 = vld [vmem:[%s4095_s1 + $0x608] sm:$0xff]  }
  0x96   :  { %2938 = vmatprep.subr.bf16.mxu1 %v3249_v46 }
  0x97   :  { %2917 = vmatpush3.bf16.msra.mxu0 %v3248_v45  ;;  %v3307_v45 = vld [vmem:[%s4096_s0 + $0x60] ss:$0 sps:$4 sm:$0xff]  }
  0x98   :  { %2918 = vmatprep.subr.bf16.mxu0 %v3251_v48 }
  0x99   :  { %2939 = vmatpush3.bf16.msra.mxu1 %v3250_v47  ;;  %v2486_v47 = vld [vmem:[%s4097_s2] ss:$0 sm:$0xff] }
  0x9a   :  { %2940 = vmatprep.subr.bf16.mxu1 %v3253_v50 }
  0x9b   :  { %2919 = vmatpush3.bf16.msra.mxu0 %v3252_v49 }
  0x9c   :  { %2920 = vmatprep.subr.bf16.mxu0 %v3255_v52 }
  0x9d   :  { %2941 = vmatpush3.bf16.msra.mxu1 %v3254_v51 }
  0x9e   :  { %2942 = vmatprep.subr.bf16.mxu1 %v3257_v54 }
  0x9f   :  { %2921 = vmatpush3.bf16.msra.mxu0 %v3256_v53 }
  0xa0   :  { %2950 = vmatprep.subr.bf16.mxu0 %v3261_v59 }
  0xa1   :  { %2943 = vmatpush3.bf16.msra.mxu1 %v3260_v58 }
  0xa2   :  { %2088 = vmatmul.mubr.bf16.vlgmr.msra.gmra.mxu0 %v2503_v56  ;;  %2972 = vmatprep.subr.bf16.mxu1 %v3265_v0 }
  0xa3   :  { %2951 = vmatpush3.bf16.msra.mxu0 %v3264_v63  ;;  %2167 = vmatprep.mubr.bf16.mxu0 %v2508_v31  ;;  %v3320_v31 = vld [vmem:[%s4099_s5 + $0x18] sm:$0xff]  }
  0xa4   :  { %2128 = vmatmul.mubr.bf16.vlgmr.msra.gmra.mxu1 %v2505_v61  ;;  %2952 = vmatprep.subr.bf16.mxu0 %v3267_v2 }
  0xa5   :  { %2973 = vmatpush3.bf16.msra.mxu1 %v3266_v1  ;;  %2207 = vmatprep.mubr.bf16.mxu1 %v2510_v36 }
  0xa6   :  { %2974 = vmatprep.subr.bf16.mxu1 %v3269_v4 }
  0xa7   :  { %2953 = vmatpush3.bf16.msra.mxu0 %v3268_v3 }
  0xa8   :  { %2954 = vmatprep.subr.bf16.mxu0 %v3271_v6 }
  0xa9   :  { %2975 = vmatpush3.bf16.msra.mxu1 %v3270_v5 }
  0xaa   :  { %2976 = vmatprep.subr.bf16.mxu1 %v3273_v8  ;;  %v3309_v8 = vld [vmem:[%s4098_s3 + $0x30] sm:$0xff]  }
  0xab   :  { %2955 = vmatpush3.bf16.msra.mxu0 %v3272_v7  ;;  %v3308_v7 = vld [vmem:[%s4098_s3 + $0x38] sm:$0xff]  }
  0xac   :  { %2956 = vmatprep.subr.bf16.mxu0 %v3275_v10  ;;  %v3311_v10 = vld [vmem:[%s4098_s3 + $0x20] sm:$0xff]  }
  0xad   :  { %2977 = vmatpush3.bf16.msra.mxu1 %v3274_v9  ;;  %v3310_v9 = vld [vmem:[%s4098_s3 + $0x28] sm:$0xff]  }
  0xae   :  { %2978 = vmatprep.subr.bf16.mxu1 %v3277_v12  ;;  %v3313_v12 = vld [vmem:[%s4098_s3 + $0x10] sm:$0xff]  }
  0xaf   :  { %2957 = vmatpush3.bf16.msra.mxu0 %v3276_v11  ;;  %v3312_v11 = vld [vmem:[%s4098_s3 + $0x18] sm:$0xff]  }
  0xb0   :  { %2958 = vmatprep.subr.bf16.mxu0 %v3279_v14  ;;  %v3314_v14 = vld [vmem:[%s4098_s3 + $0x8] sm:$0xff]  }
  0xb1   :  { %2979 = vmatpush3.bf16.msra.mxu1 %v3278_v13 }
  0xb2   :  { %2980 = vmatprep.subr.bf16.mxu1 %v3281_v16 }
  0xb3   :  { %2959 = vmatpush3.bf16.msra.mxu0 %v3280_v15 }
  0xb4   :  { %2960 = vmatprep.subr.bf16.mxu0 %v3283_v18 }
  0xb5   :  { %2981 = vmatpush3.bf16.msra.mxu1 %v3282_v17 }
  0xb6   :  { %2982 = vmatprep.subr.bf16.mxu1 %v3285_v20  ;;  %v3315_v20 = vld [vmem:[%s4098_s3] sm:$0xff]  }
  0xb7   :  { %2961 = vmatpush3.bf16.msra.mxu0 %v3284_v19 }
  0xb8   :  { %2962 = vmatprep.subr.bf16.mxu0 %v3287_v22 }
  0xb9   :  { %2983 = vmatpush3.bf16.msra.mxu1 %v3286_v21 }
  0xba   :  { %2984 = vmatprep.subr.bf16.mxu1 %v3289_v24 }
  0xbb   :  { %2963 = vmatpush3.bf16.msra.mxu0 %v3288_v23 }
  0xbc   :  { %2964 = vmatprep.subr.bf16.mxu0 %v3291_v26 }
  0xbd   :  { %2985 = vmatpush3.bf16.msra.mxu1 %v3290_v25 }
  0xbe   :  { %2986 = vmatprep.subr.bf16.mxu1 %v3293_v28  ;;  %v3317_v28 = vld [vmem:[%s4099_s5 + $0x30] sm:$0xff]  }
  0xbf   :  { %2965 = vmatpush3.bf16.msra.mxu0 %v3292_v27  ;;  %v3316_v27 = vld [vmem:[%s4099_s5 + $0x38] sm:$0xff]  }
  0xc0   :  { %3021 = vmatprep.subr.bf16.mxu0 %v3324_v34 }
  0xc1   :  { %2987 = vmatpush3.bf16.msra.mxu1 %v3296_v32  ;;  %v3321_v32 = vld [vmem:[%s4099_s5 + $0x10] sm:$0xff]  }
  0xc2   :  { %2168 = vmatmul.mubr.bf16.vlgmr.msra.gmra.mxu0 %v2507_v30  ;;  %3041 = vmatprep.subr.bf16.mxu1 %v3324_v34  ;;  %v3319_v30 = vld [vmem:[%s4099_s5 + $0x20] sm:$0xff]  }
  0xc3   :  { %3022 = vmatpush3.bf16.msra.mxu0 %v3299_v37  ;;  %3037 = vmatprep.mubr.msk.bf16.mxu0 %vm3325_vm0, %v3324_v34 }
  0xc4   :  { %2208 = vmatmul.mubr.bf16.vlgmr.msra.gmra.mxu1 %v2509_v35  ;;  %3023 = vmatprep.subr.bf16.mxu0 %v3324_v34 }
  0xc5   :  { %3057 = vmatprep.mubr.msk.bf16.mxu1 %vm3325_vm0, %v3324_v34  ;;  %3042 = vmatpush3.bf16.msra.mxu1 %v3308_v7 }
  0xc6   :  { %3043 = vmatprep.subr.bf16.mxu1 %v3324_v34 }
  0xc7   :  { %3024 = vmatpush3.bf16.msra.mxu0 %v3300_v38 }
  0xc8   :  { %3025 = vmatprep.subr.bf16.mxu0 %v3324_v34 }
  0xc9   :  { %3044 = vmatpush3.bf16.msra.mxu1 %v3309_v8 }
  0xca   :  { %3045 = vmatprep.subr.bf16.mxu1 %v3324_v34 }
  0xcb   :  { %3026 = vmatpush3.bf16.msra.mxu0 %v3301_v39 }
  0xcc   :  { %3027 = vmatprep.subr.bf16.mxu0 %v3324_v34 }
  0xcd   :  { %3046 = vmatpush3.bf16.msra.mxu1 %v3310_v9 }
  0xce   :  { %3047 = vmatprep.subr.bf16.mxu1 %v3324_v34 }
  0xcf   :  { %3028 = vmatpush3.bf16.msra.mxu0 %v3302_v40 }
  0xd0   :  { %3029 = vmatprep.subr.bf16.mxu0 %v3324_v34 }
  0xd1   :  { %3048 = vmatpush3.bf16.msra.mxu1 %v3311_v10 }
  0xd2   :  { %3049 = vmatprep.subr.bf16.mxu1 %v3324_v34 }
  0xd3   :  { %3030 = vmatpush3.bf16.msra.mxu0 %v3303_v41 }
  0xd4   :  { %3031 = vmatprep.subr.bf16.mxu0 %v3324_v34 }
  0xd5   :  { %3050 = vmatpush3.bf16.msra.mxu1 %v3312_v11 }
  0xd6   :  { %3051 = vmatprep.subr.bf16.mxu1 %v3324_v34 }
  0xd7   :  { %3032 = vmatpush3.bf16.msra.mxu0 %v3304_v42 }
  0xd8   :  { %3033 = vmatprep.subr.bf16.mxu0 %v3324_v34 }
  0xd9   :  { %3052 = vmatpush3.bf16.msra.mxu1 %v3313_v12 }
  0xda   :  { %3053 = vmatprep.subr.bf16.mxu1 %v3324_v34 }
  0xdb   :  { %3034 = vmatpush3.bf16.msra.mxu0 %v3305_v43 }
  0xdc   :  { %3035 = vmatprep.subr.bf16.mxu0 %v3324_v34 }
  0xdd   :  { %3054 = vmatpush3.bf16.msra.mxu1 %v3314_v14  ;;  %v3323_v14 = vld [vmem:[%s4099_s5] sm:$0xff]  }
  0xde   :  { %3055 = vmatprep.subr.bf16.mxu1 %v3324_v34 }
  0xdf   :  { %3036 = vmatpush3.bf16.msra.mxu0 %v3306_v44 }
  0xe0   :  { %3061 = vmatprep.subr.bf16.mxu0 %v3324_v34 }
  0xe1   :  { %3056 = vmatpush3.bf16.msra.mxu1 %v3315_v20 }
  0xe2   :  { %v2746_v46 = vpop.f32.mrf.mxu0  ;;  %3038 = vmatmul.mubr.bf16.vlgmr.msra.gmra.mxu0 %v3307_v45 }
  0xe3   :  { %3077 = vmatprep.mubr.msk.bf16.mxu0 %vm3325_vm0, %v3324_v34  ;;  %3062 = vmatpush3.bf16.msra.mxu0 %v3316_v27 }
  0xe4   :  { %v2747_v48 = vpop.f32.mrf.mxu0  ;;  %v2768_v49 = vpop.f32.mrf.mxu1  ;;  %3063 = vmatprep.subr.bf16.mxu0 %v3324_v34 }
  0xe5   :  { %v2748_v50 = vadd.f32 %v2747_v48, %v2746_v46 }
  0xe6   :  { %v2749_v51 = vpop.f32.mrf.mxu0  ;;  %v2769_v52 = vpop.f32.mrf.mxu1 }
  0xe7   :  { %v1770_v53 = vadd.f32 %v2748_v50, %v2486_v47  ;;  %v2770_v54 = vadd.f32 %v2769_v52, %v2768_v49  ;;  %3064 = vmatpush3.bf16.msra.mxu0 %v3317_v28 }
  0xe8   :  { %v2750_v55 = vpop.f32.mrf.mxu0  ;;  %v2771_v56 = vpop.f32.mrf.mxu1  ;;  %3065 = vmatprep.subr.bf16.mxu0 %v3324_v34 }
  0xe9   :  { %v1810_v57 = vadd.f32 %v2770_v54, %v1770_v53 }
  0xea   :  { %v2772_v58 = vpop.f32.mrf.mxu1 }
  0xeb   :  { %3066 = vmatpush3.bf16.msra.mxu0 %v3318_v29 }
  0xec   :  { %3067 = vmatprep.subr.bf16.mxu0 %v3324_v34 }
  0xef   :  { %3068 = vmatpush3.bf16.msra.mxu0 %v3319_v30 }
  0xf0   :  { %3069 = vmatprep.subr.bf16.mxu0 %v3324_v34 }
  0xf3   :  { %3070 = vmatpush3.bf16.msra.mxu0 %v3320_v31 }
  0xf4   :  { %3071 = vmatprep.subr.bf16.mxu0 %v3324_v34 }
  0xf7   :  { %3072 = vmatpush3.bf16.msra.mxu0 %v3321_v32 }
  0xf8   :  { %3073 = vmatprep.subr.bf16.mxu0 %v3324_v34 }
 0x102   :  { %v2790_v59 = vpop.f32.mrf.mxu0 }
 0x104   :  { %v2791_v60 = vpop.f32.mrf.mxu0  ;;  %v2812_v62 = vpop.f32.mrf.mxu1 }
 0x105   :  { %v2792_v61 = vadd.f32 %v2791_v60, %v2790_v59 }
 0x106   :  { %v2793_v63 = vpop.f32.mrf.mxu0  ;;  %v2813_v1 = vpop.f32.mrf.mxu1 }
 0x107   :  { %v1850_v0 = vadd.f32 %v2792_v61, %v1810_v57  ;;  %v2814_v2 = vadd.f32 %v2813_v1, %v2812_v62 }
 0x108   :  { %v2794_v3 = vpop.f32.mrf.mxu0  ;;  %v2815_v4 = vpop.f32.mrf.mxu1 }
 0x109   :  { %v1890_v5 = vadd.f32 %v2814_v2, %v1850_v0 }
 0x10a   :  { %v2816_v6 = vpop.f32.mrf.mxu1 }
 0x122   :  { %v2834_v13 = vpop.f32.mrf.mxu0 }
 0x124   :  { %v2835_v15 = vpop.f32.mrf.mxu0  ;;  %v2856_v16 = vpop.f32.mrf.mxu1 }
 0x125   :  { %v2836_v17 = vadd.f32 %v2835_v15, %v2834_v13  ;;  %v3322_v13 = vld [vmem:[%s4099_s5 + $0x8] sm:$0xff]   ;;  %v2712_v15 = vld [vmem:[%s4100_s4] ss:$0 sm:$0xff] }
 0x126   :  { %v2837_v18 = vpop.f32.mrf.mxu0  ;;  %v2857_v19 = vpop.f32.mrf.mxu1  ;;  %3074 = vmatpush3.bf16.msra.mxu0 %v3322_v13 }
 0x127   :  { %v1930_v21 = vadd.f32 %v2836_v17, %v1890_v5  ;;  %v2858_v22 = vadd.f32 %v2857_v19, %v2856_v16  ;;  %3075 = vmatprep.subr.bf16.mxu0 %v3324_v34  ;;  %v2721_v34 = vld [vmem:[%s4101_s6] ss:$0 sm:$0xff] }
 0x128   :  { %v2838_v23 = vpop.f32.mrf.mxu0  ;;  %v2859_v24 = vpop.f32.mrf.mxu1 }
 0x129   :  { %v1970_v25 = vadd.f32 %v2858_v22, %v1930_v21 }
 0x12a   :  { %v2860_v26 = vpop.f32.mrf.mxu1  ;;  %3076 = vmatpush3.bf16.msra.mxu0 %v3323_v14 }
 0x142   :  { %v2878_v33 = vpop.f32.mrf.mxu0 }
 0x144   :  { %v2879_v35 = vpop.f32.mrf.mxu0  ;;  %v2900_v36 = vpop.f32.mrf.mxu1 }
 0x145   :  { %v2880_v37 = vadd.f32 %v2879_v35, %v2878_v33 }
 0x146   :  { %v2881_v38 = vpop.f32.mrf.mxu0  ;;  %v2901_v39 = vpop.f32.mrf.mxu1 }
 0x147   :  { %v2010_v40 = vadd.f32 %v2880_v37, %v1970_v25  ;;  %v2902_v41 = vadd.f32 %v2901_v39, %v2900_v36 }
 0x148   :  { %v2882_v42 = vpop.f32.mrf.mxu0  ;;  %v2903_v43 = vpop.f32.mrf.mxu1 }
 0x149   :  { %v2050_v44 = vadd.f32 %v2902_v41, %v2010_v40 }
 0x14a   :  { %v2904_v45 = vpop.f32.mrf.mxu1 }
 0x162   :  { %v2922_v46 = vpop.f32.mrf.mxu0 }
 0x164   :  { %v2923_v47 = vpop.f32.mrf.mxu0  ;;  %v2944_v48 = vpop.f32.mrf.mxu1 }
 0x165   :  { %v2924_v62 = vadd.f32 %v2923_v47, %v2922_v46 }
 0x166   :  { %v2925_v49 = vpop.f32.mrf.mxu0  ;;  %v2945_v50 = vpop.f32.mrf.mxu1 }
 0x167   :  { %v2090_v63 = vadd.f32 %v2924_v62, %v2050_v44  ;;  %v2946_v0 = vadd.f32 %v2945_v50, %v2944_v48 }
 0x168   :  { %v2926_v51 = vpop.f32.mrf.mxu0  ;;  %v2947_v52 = vpop.f32.mrf.mxu1 }
 0x169   :  { %v2130_v2 = vadd.f32 %v2946_v0, %v2090_v63 }
 0x16a   :  { %v2948_v53 = vpop.f32.mrf.mxu1 }
 0x182   :  { %v2966_v54 = vpop.f32.mrf.mxu0 }
 0x184   :  { %v2967_v55 = vpop.f32.mrf.mxu0  ;;  %v2988_v56 = vpop.f32.mrf.mxu1 }
 0x185   :  { %v2968_v1 = vadd.f32 %v2967_v55, %v2966_v54 }
 0x186   :  { %v2969_v57 = vpop.f32.mrf.mxu0  ;;  %v2989_v58 = vpop.f32.mrf.mxu1 }
 0x187   :  { %v2170_v3 = vadd.f32 %v2968_v1, %v2130_v2  ;;  %v2990_v4 = vadd.f32 %v2989_v58, %v2988_v56 }
 0x188   :  { %v2970_v59 = vpop.f32.mrf.mxu0  ;;  %v2991_v60 = vpop.f32.mrf.mxu1 }
 0x189   :  { %v2210_v5 = vadd.f32 %v2990_v4, %v2170_v3 }
 0x18a   :  { %v2992_v61 = vpop.f32.mrf.mxu1 }
 0x1a2   :  { %v2249_v6 = vpop.f32.mrf.mxu0 }
 0x1a3   :  { %v2250_v7 = vadd.f32 %v2249_v6, %v2210_v5 }
 0x1a4   :  { %v3039_v8 = vpop.f32.mrf.mxu0 }
 0x1a5   :  { %v2255_v9 = vmax.f32 %v2250_v7, 0.0 }
 0x1a6   :  { %v2252_v10 = vpop.f32.mrf.mxu0 }
 0x1a7   :  { %v2256_v11 = vpack.c.bf16 %v2255_v9, %v2255_v9 }
 0x1a8   :  { %v3040_v12 = vpop.f32.mrf.mxu0 }
 0x1a9   :  { %3058 = vmatmul.mubr.bf16.vlgmr.msra.gmra.mxu1 %v2256_v11 }
 0x269   :  { %v2362_v16 = vpop.f32.mrf.mxu1 }
 0x26a   :  { %v2363_v17 = vadd.f32 %v2712_v15, %v2362_v16 }
 0x26b   :  { %v3059_v18 = vpop.f32.mrf.mxu1 }
 0x26c   :  { %v2368_v19 = vmax.f32 %v2363_v17, 0.0 }
 0x26d   :  { %v2365_v20 = vpop.f32.mrf.mxu1 }
 0x26e   :  { %v2369_v21 = vpack.c.bf16 %v2368_v19, %v2368_v19 }
 0x26f   :  { %v3060_v22 = vpop.f32.mrf.mxu1 }
 0x270   :  { %3078 = vmatmul.mubr.bf16.vlgmr.msra.gmra.mxu0 %v2369_v21 }
 0x330   :  { %v2475_v23 = vpop.f32.mrf.mxu0 }
 0x331   :  { %v2476_v24 = vadd.f32 %v2721_v34, %v2475_v23 }
 0x332   :  { %v3079_v25 = vpop.f32.mrf.mxu0 }
 0x333   :  { %2481 = vst [vmem:[%s4102_s7] sm:$0xff] %v2476_v24 }
 0x334   :  { %v2478_v26 = vpop.f32.mrf.mxu0 }
 0x336   :  { %v3080_v27 = vpop.f32.mrf.mxu0 }

</bundles_post_ra>
